<compile_context>
chip_gen: v7x
topology: tpu7x:2x2x1
jax: 0.10.0
libtpu: 0.0.40
codegen_flags: <defaults>
</compile_context>

<pallas_src>
import jax
import jax.numpy as jnp
from jax.experimental import pallas as pl
from jax.experimental.pallas import tpu as pltpu


_BN_EPS = 1e-5


# ----------------------------------------------------------------------------
# small math helpers (used both in-kernel and by the pure-JAX reference)
# ----------------------------------------------------------------------------
def _softplus(x):
    # numerically stable softplus (matches F.softplus, beta=1)
    return jnp.maximum(x, 0.0) + jnp.log1p(jnp.exp(-jnp.abs(x)))


def _batchnorm_train(h, gamma, beta):
    # BatchNorm1d in training mode: batch stats, biased variance, eps=1e-5.
    # Two-pass variance for parity with the PyTorch reference (finalize
    # compute is effectively free, so no single-sweep trick here).
    mu = jnp.mean(h, axis=0, keepdims=True)
    d = h - mu
    var = jnp.mean(d * d, axis=0, keepdims=True)
    return d * jax.lax.rsqrt(var + _BN_EPS) * gamma + beta


# ----------------------------------------------------------------------------
# Call 1: streaming max-pool over the sequence axis
# ----------------------------------------------------------------------------
def _make_stream_kernel(off1, n_l, tl, rag):
    """off1: per-chunk starting block = c*off1; n_l: #L blocks; rag: L % tl."""

    def kernel(x1_ref, x2_ref, z1_ref, z2_ref):
        c = pl.program_id(0)
        l = pl.program_id(1)

        @pl.when(l == 0)
        def _init():
            z1_ref[...] = jnp.full_like(z1_ref, -jnp.inf)
            z2_ref[...] = jnp.full_like(z2_ref, -jnp.inf)

        def update(x1, x2):
            # max is exact in the input dtype; cast only the [B,H] partial.
            z1_ref[0] = jnp.maximum(z1_ref[0],
                                    jnp.max(x1, axis=1).astype(jnp.float32))
            z2_ref[0] = jnp.maximum(z2_ref[0],
                                    jnp.max(x2, axis=1).astype(jnp.float32))

        if rag == 0:
            update(x1_ref[...], x2_ref[...])
        else:
            g = c * off1 + l                      # global L-block index
            is_last = g == (n_l - 1)              # only block with a ragged tail

            @pl.when(g < n_l - 1)
            def _full():
                update(x1_ref[...], x2_ref[...])

            @pl.when(is_last)
            def _tail():
                # The clipped tail DMA leaves stale data in the buffer; mask it
                # to -inf (max identity) before reducing.  Only runs once.
                valid = jax.lax.broadcasted_iota(
                    jnp.int32, (1, tl, x1_ref.shape[-1]), 1) < rag
                x1m = jnp.where(valid, x1_ref[...],
                                jnp.array(-jnp.inf, x1_ref.dtype))
                x2m = jnp.where(valid, x2_ref[...],
                                jnp.array(-jnp.inf, x2_ref.dtype))
                update(x1m, x2m)

    return kernel


# ----------------------------------------------------------------------------
# Call 2: combine per-chunk maxes + fused discriminator + loss (tiny)
# ----------------------------------------------------------------------------
def _finalize_kernel(z1p_ref, z2p_ref,
                     w1a_ref, w1b_ref, g1_ref, b1_ref,
                     w2_ref, g2_ref, b2_ref,
                     out_ref):
    z1 = jnp.max(z1p_ref[...], axis=0)        # (B, H) f32
    z2 = jnp.max(z2p_ref[...], axis=0)
    b = z1.shape[0]

    # fc1 on cat([z, z2], -1), concat folded into split weights (f32 matmuls:
    # these are tiny, so exact-parity f32 costs essentially nothing).
    #   a_term = z1 @ w1a   (the "prime" branch reuses it via a batch roll)
    #   b_term = z2 @ w1b   (identical for both branches -> computed once)
    a_term = jnp.dot(z1, w1a_ref[...], preferred_element_type=jnp.float32)
    b_term = jnp.dot(z2, w1b_ref[...], preferred_element_type=jnp.float32)
    # prime[i] = z1[(i+1) % B]  (== torch.cat([z1[1:], z1[:1]]))
    # TODO(synk): verify pltpu.roll on a partial sublane tile if B % 8 != 0.
    a_prime = pltpu.roll(a_term, shift=b - 1, axis=0)

    g1 = g1_ref[...]
    b1 = b1_ref[...]
    h_pos = jnp.maximum(_batchnorm_train(a_term + b_term, g1, b1), 0.0)
    h_neg = jnp.maximum(_batchnorm_train(a_prime + b_term, g1, b1), 0.0)

    # fc2: both branches batched into a single [2B, H] MXU push.
    h_cat = jnp.concatenate([h_pos, h_neg], axis=0)
    h2 = jnp.dot(h_cat, w2_ref[...], preferred_element_type=jnp.float32)

    # bn2 (BatchNorm1dNoBias, bias frozen at 0): stats stay per-branch.
    g2 = g2_ref[...]
    b2 = b2_ref[...]
    d_pos = _batchnorm_train(h2[:b], g2, b2)   # discr_g(input_1, input_2)
    d_neg = _batchnorm_train(h2[b:], g2, b2)   # discr_g(input_1_prime, input_2)

    ej = -jnp.mean(_softplus(-d_pos))
    em = jnp.mean(_softplus(d_neg))
    out_ref[...] = jnp.reshape(em - ej, (1, 1))   # GLOBAL * 1.0


# ----------------------------------------------------------------------------
# sizing helpers
# ----------------------------------------------------------------------------
def _round_up(x, m):
    return ((x + m - 1) // m) * m


def _vmem_capacity_bytes():
    """Generation-aware VMEM capacity; conservative fallback (v7x per-TC)."""
    default = 64 * 1024 * 1024
    try:
        info = pltpu.get_tpu_info()
    except Exception:
        return default
    for name in ("vmem_capacity_bytes", "vmem_size_bytes", "vmem_bytes"):
        cap = getattr(info, name, None)
        if cap:
            return int(cap)
    return default


def _choose_l_tile(b, l, h, itemsize, budget_bytes):
    """Largest multiple-of-8 L tile s.t. 2 inputs x 2 pipeline buffers fit."""
    bytes_per_l = 2 * 2 * b * h * itemsize
    max_tl = max(8, (budget_bytes // bytes_per_l) // 8 * 8)
    return int(min(_round_up(l, 8), max_tl))


# ----------------------------------------------------------------------------
# parameters (PyTorch-default init, shapes from __init__)
# ----------------------------------------------------------------------------
def init_params(key, hidden):
    k1, k2 = jax.random.split(key)
    # nn.Linear default: U(-1/sqrt(fan_in), 1/sqrt(fan_in)); weight is [out, in]
    lim1 = 1.0 / (2 * hidden) ** 0.5
    w1 = jax.random.uniform(k1, (hidden, 2 * hidden), jnp.float32, -lim1, lim1)
    lim2 = 1.0 / hidden ** 0.5
    w2 = jax.random.uniform(k2, (hidden, hidden), jnp.float32, -lim2, lim2)
    return dict(
        w1a=jnp.asarray(w1[:, :hidden].T),   # [H, H]: acts on the input_1 half
        w1b=jnp.asarray(w1[:, hidden:].T),   # [H, H]: acts on the input_2 half
        w2=jnp.asarray(w2.T),                # [H, H]
        g1=jnp.ones((1, hidden), jnp.float32),
        b1=jnp.zeros((1, hidden), jnp.float32),
        g2=jnp.ones((1, hidden), jnp.float32),
        b2=jnp.zeros((1, hidden), jnp.float32),  # BatchNorm1dNoBias bias (frozen 0)
    )


# ----------------------------------------------------------------------------
# forward
# ----------------------------------------------------------------------------
def deep_infomax_forward(input_1, input_2, params, *, l_tile=None):
    """input_1, input_2: [B, L, H].  Returns the scalar GLOBAL loss.

    The kernel is HBM-bound on the streamed [B,L,H] tensors: provide bf16
    activations from the producer if possible (this wrapper never casts the
    activations -- a boundary cast would cost an extra HBM pass)."""
    B, L, H = input_1.shape
    assert input_2.shape == (B, L, H)
    itemsize = jnp.dtype(input_1.dtype).itemsize

    cap = _vmem_capacity_bytes()
    vmem_limit = int(cap * 0.90)          # explicit, generation-aware limit
    x_budget = int(cap * 0.60)            # for 2 inputs x 2 pipeline buffers

    tl = l_tile if l_tile is not None else _choose_l_tile(B, L, H, itemsize, x_budget)
    tl = int(min(tl, _round_up(L, 8)))
    n_l = -(-L // tl)                      # number of L blocks (ceil)
    rag = L % tl                           # ragged rows in the last block

    # v7x: split the L stream across both TensorCores via a parallel leading
    # grid axis.  Chunk c covers blocks [c*off1, c*off1 + n_half); when n_l is
    # odd the two ranges overlap by one block (harmless for a max reduction).
    num_chunks = 2 if n_l >= 2 else 1
    n_half = -(-n_l // num_chunks)
    off1 = n_l - n_half

    x_spec = pl.BlockSpec((B, tl, H), lambda c, l: (0, c * off1 + l, 0))
    z_spec = pl.BlockSpec((1, B, H), lambda c, l: (c, 0, 0))

    stream_cost = pl.CostEstimate(
        flops=2 * B * L * H,
        transcendentals=0,
        bytes_accessed=2 * B * L * H * itemsize + 2 * num_chunks * B * H * 4,
    )

    z1_part, z2_part = pl.pallas_call(
        _make_stream_kernel(off1, n_l, tl, rag),
        grid=(num_chunks, n_half),
        in_specs=[x_spec, x_spec],
        out_specs=(z_spec, z_spec),
        out_shape=(jax.ShapeDtypeStruct((num_chunks, B, H), jnp.float32),
                   jax.ShapeDtypeStruct((num_chunks, B, H), jnp.float32)),
        compiler_params=pltpu.CompilerParams(
            dimension_semantics=("parallel", "arbitrary"),
            vmem_limit_bytes=vmem_limit),
        cost_estimate=stream_cost,
    )(input_1, input_2)

    fin_cost = pl.CostEstimate(
        flops=8 * B * H * H,
        transcendentals=6 * B * H,
        bytes_accessed=2 * num_chunks * B * H * 4 + 3 * H * H * 4 + 4 * H * 4 + 4,
    )
    out = pl.pallas_call(
        _finalize_kernel,
        out_shape=jax.ShapeDtypeStruct((1, 1), jnp.float32),
        cost_estimate=fin_cost,
    )(z1_part, z2_part,
      params["w1a"], params["w1b"], params["g1"], params["b1"],
      params["w2"], params["g2"], params["b2"])
    return out[0, 0]


# ----------------------------------------------------------------------------
# pure-JAX reference (tolerance check)
# ----------------------------------------------------------------------------
def deep_infomax_reference(input_1, input_2, params):
    x1 = input_1.astype(jnp.float32)
    x2 = input_2.astype(jnp.float32)
    z1 = jnp.max(x1, axis=1)
    z2 = jnp.max(x2, axis=1)
    z1p = jnp.concatenate([z1[1:], z1[:1]], axis=0)
    w1 = jnp.concatenate([params["w1a"], params["w1b"]], axis=0)   # [2H, H]

    def discr(a, b):
        h = jnp.concatenate([a, b], axis=-1) @ w1
        h = jnp.maximum(_batchnorm_train(h, params["g1"], params["b1"]), 0.0)
        h = h @ params["w2"]
        return _batchnorm_train(h, params["g2"], params["b2"])

    ej = -jnp.mean(_softplus(-discr(z1, z2)))
    em = jnp.mean(_softplus(discr(z1p, z2)))
    return em - ej


if __name__ == "__main__":
    # Small shapes: batch=8 (sublane aligned), seq=20 (deliberately NOT a
    # multiple of the forced l_tile=8 so the in-kernel ragged mask, the
    # 2-chunk parallel split and the overlap block are all exercised),
    # hidden=128 (lane aligned).  bf16 activations come from the producer.
    B, L, H = 8, 20, 128

    key = jax.random.PRNGKey(0)
    k_in1, k_in2, k_params = jax.random.split(key, 3)
    input_1 = jax.random.normal(k_in1, (B, L, H), jnp.float32).astype(jnp.bfloat16)
    input_2 = jax.random.normal(k_in2, (B, L, H), jnp.float32).astype(jnp.bfloat16)
    params = init_params(k_params, H)

    fwd = jax.jit(deep_infomax_forward, static_argnames=("l_tile",))
    result = fwd(input_1, input_2, params, l_tile=8)   # force multi-block path
    jax.block_until_ready(result)

    ref = deep_infomax_reference(input_1, input_2, params)
    assert result.shape == () and bool(jnp.isfinite(result))
    assert abs(float(result) - float(ref)) < 5e-3, (float(result), float(ref))
    print("KERNEL_OK")
</pallas_src>

<mosaic_0001>
module attributes {stable_mosaic.version = 11 : i64} {
  func.func @kernel(%arg0: i32, %arg1: i32, %arg2: memref<8x8x128xbf16, #tpu.memory_space<vmem>>, %arg3: memref<8x8x128xbf16, #tpu.memory_space<vmem>>, %arg4: memref<1x8x128xf32, #tpu.memory_space<vmem>>, %arg5: memref<1x8x128xf32, #tpu.memory_space<vmem>>) attributes {dimension_semantics = [#tpu.dimension_semantics<parallel>, #tpu.dimension_semantics<arbitrary>], iteration_bounds = array<i64: 2, 2>, scalar_prefetch = 0 : i64, scratch_operands = 0 : i64, tpu.core_type = #tpu.core_type<tc>, window_params = [{transform_indices = @transform_0, window_bounds = array<i64: 8, 8, 128>}, {transform_indices = @transform_1, window_bounds = array<i64: 8, 8, 128>}, {transform_indices = @transform_2, window_bounds = array<i64: 1, 8, 128>}, {transform_indices = @transform_3, window_bounds = array<i64: 1, 8, 128>}]} {
    %c0_i32 = arith.constant 0 : i32
    %0 = arith.cmpi eq, %arg1, %c0_i32 : i32
    %1 = arith.extui %0 : i1 to i32
    %c0_i32_0 = arith.constant 0 : i32
    %2 = arith.cmpi ne, %1, %c0_i32_0 : i32
    scf.if %2 {
      %cst = arith.constant 0xFF800000 : f32
      %11 = vector.broadcast %cst : f32 to vector<1x8x128xf32>
      %c0 = arith.constant 0 : index
      %c0_4 = arith.constant 0 : index
      %c0_5 = arith.constant 0 : index
      %12 = vector.load %arg4[%c0, %c0_4, %c0_5] : memref<1x8x128xf32, #tpu.memory_space<vmem>>, vector<1x8x128xf32>
      tpu.vector_store %arg4[%c0, %c0_4, %c0_5], %11 {strides = array<i32>} : memref<1x8x128xf32, #tpu.memory_space<vmem>>, vector<1x8x128xf32>,
      %cst_6 = arith.constant 0xFF800000 : f32
      %13 = vector.broadcast %cst_6 : f32 to vector<1x8x128xf32>
      %c0_7 = arith.constant 0 : index
      %c0_8 = arith.constant 0 : index
      %c0_9 = arith.constant 0 : index
      %14 = vector.load %arg5[%c0_7, %c0_8, %c0_9] : memref<1x8x128xf32, #tpu.memory_space<vmem>>, vector<1x8x128xf32>
      tpu.vector_store %arg5[%c0_7, %c0_8, %c0_9], %13 {strides = array<i32>} : memref<1x8x128xf32, #tpu.memory_space<vmem>>, vector<1x8x128xf32>,
    } else {
    }
    %c1_i32 = arith.constant 1 : i32
    %3 = arith.muli %arg0, %c1_i32 : i32
    %4 = arith.addi %3, %arg1 : i32
    %c2_i32 = arith.constant 2 : i32
    %5 = arith.cmpi eq, %4, %c2_i32 : i32
    %c2_i32_1 = arith.constant 2 : i32
    %6 = arith.cmpi slt, %4, %c2_i32_1 : i32
    %7 = arith.extui %6 : i1 to i32
    %c0_i32_2 = arith.constant 0 : i32
    %8 = arith.cmpi ne, %7, %c0_i32_2 : i32
    scf.if %8 {
      %c0 = arith.constant 0 : index
      %c0_4 = arith.constant 0 : index
      %c0_5 = arith.constant 0 : index
      %11 = vector.load %arg2[%c0, %c0_4, %c0_5] : memref<8x8x128xbf16, #tpu.memory_space<vmem>>, vector<8x8x128xbf16>
      %c0_6 = arith.constant 0 : index
      %c0_7 = arith.constant 0 : index
      %c0_8 = arith.constant 0 : index
      %12 = vector.load %arg3[%c0_6, %c0_7, %c0_8] : memref<8x8x128xbf16, #tpu.memory_space<vmem>>, vector<8x8x128xbf16>
      %c0_9 = arith.constant 0 : index
      %c0_10 = arith.constant 0 : index
      %c0_11 = arith.constant 0 : index
      %13 = vector.load %arg4[%c0_9, %c0_10, %c0_11] : memref<1x8x128xf32, #tpu.memory_space<vmem>>, vector<1x8x128xf32>
      %14 = vector.shape_cast %13 : vector<1x8x128xf32> to vector<8x128xf32>
      %cst = arith.constant dense<0xFF80> : vector<8x128xbf16>
      %15 = vector.multi_reduction <maximumf>, %11, %cst [1] : vector<8x8x128xbf16> to vector<8x128xbf16>
      %16 = arith.extf %15 : vector<8x128xbf16> to vector<8x128xf32>
      %17 = arith.maximumf %14, %16 : vector<8x128xf32>
      %c0_12 = arith.constant 0 : index
      %c0_13 = arith.constant 0 : index
      %c0_14 = arith.constant 0 : index
      %18 = vector.load %arg4[%c0_12, %c0_13, %c0_14] : memref<1x8x128xf32, #tpu.memory_space<vmem>>, vector<1x8x128xf32>
      %19 = vector.shape_cast %18 : vector<1x8x128xf32> to vector<8x128xf32>
      %20 = vector.shape_cast %17 : vector<8x128xf32> to vector<1x8x128xf32>
      tpu.vector_store %arg4[%c0_12, %c0_13, %c0_14], %20 {strides = array<i32>} : memref<1x8x128xf32, #tpu.memory_space<vmem>>, vector<1x8x128xf32>,
      %c0_15 = arith.constant 0 : index
      %c0_16 = arith.constant 0 : index
      %c0_17 = arith.constant 0 : index
      %21 = vector.load %arg5[%c0_15, %c0_16, %c0_17] : memref<1x8x128xf32, #tpu.memory_space<vmem>>, vector<1x8x128xf32>
      %22 = vector.shape_cast %21 : vector<1x8x128xf32> to vector<8x128xf32>
      %cst_18 = arith.constant dense<0xFF80> : vector<8x128xbf16>
      %23 = vector.multi_reduction <maximumf>, %12, %cst_18 [1] : vector<8x8x128xbf16> to vector<8x128xbf16>
      %24 = arith.extf %23 : vector<8x128xbf16> to vector<8x128xf32>
      %25 = arith.maximumf %22, %24 : vector<8x128xf32>
      %c0_19 = arith.constant 0 : index
      %c0_20 = arith.constant 0 : index
      %c0_21 = arith.constant 0 : index
      %26 = vector.load %arg5[%c0_19, %c0_20, %c0_21] : memref<1x8x128xf32, #tpu.memory_space<vmem>>, vector<1x8x128xf32>
      %27 = vector.shape_cast %26 : vector<1x8x128xf32> to vector<8x128xf32>
      %28 = vector.shape_cast %25 : vector<8x128xf32> to vector<1x8x128xf32>
      tpu.vector_store %arg5[%c0_19, %c0_20, %c0_21], %28 {strides = array<i32>} : memref<1x8x128xf32, #tpu.memory_space<vmem>>, vector<1x8x128xf32>,
    } else {
    }
    %9 = arith.extui %5 : i1 to i32
    %c0_i32_3 = arith.constant 0 : i32
    %10 = arith.cmpi ne, %9, %c0_i32_3 : i32
    scf.if %10 {
      %11 = tpu.iota {dimensions = array<i32: 1>} : vector<1x8x128xi32>
      %c4_i32 = arith.constant 4 : i32
      %12 = vector.broadcast %c4_i32 : i32 to vector<1x8x128xi32>
      %13 = arith.cmpi slt, %11, %12 : vector<1x8x128xi32>
      %c0 = arith.constant 0 : index
      %c0_4 = arith.constant 0 : index
      %c0_5 = arith.constant 0 : index
      %14 = vector.load %arg2[%c0, %c0_4, %c0_5] : memref<8x8x128xbf16, #tpu.memory_space<vmem>>, vector<8x8x128xbf16>
      %cst = arith.constant 0xFF80 : bf16
      %15 = vector.shape_cast %13 : vector<1x8x128xi1> to vector<1x8x128xi1>
      %16 = vector.broadcast %15 : vector<1x8x128xi1> to vector<8x8x128xi1>
      %17 = vector.broadcast %cst : bf16 to vector<8x8x128xbf16>
      %18 = arith.select %16, %14, %17 : vector<8x8x128xi1>, vector<8x8x128xbf16>
      %c0_6 = arith.constant 0 : index
      %c0_7 = arith.constant 0 : index
      %c0_8 = arith.constant 0 : index
      %19 = vector.load %arg3[%c0_6, %c0_7, %c0_8] : memref<8x8x128xbf16, #tpu.memory_space<vmem>>, vector<8x8x128xbf16>
      %cst_9 = arith.constant 0xFF80 : bf16
      %20 = vector.shape_cast %13 : vector<1x8x128xi1> to vector<1x8x128xi1>
      %21 = vector.broadcast %20 : vector<1x8x128xi1> to vector<8x8x128xi1>
      %22 = vector.broadcast %cst_9 : bf16 to vector<8x8x128xbf16>
      %23 = arith.select %21, %19, %22 : vector<8x8x128xi1>, vector<8x8x128xbf16>
      %c0_10 = arith.constant 0 : index
      %c0_11 = arith.constant 0 : index
      %c0_12 = arith.constant 0 : index
      %24 = vector.load %arg4[%c0_10, %c0_11, %c0_12] : memref<1x8x128xf32, #tpu.memory_space<vmem>>, vector<1x8x128xf32>
      %25 = vector.shape_cast %24 : vector<1x8x128xf32> to vector<8x128xf32>
      %cst_13 = arith.constant dense<0xFF80> : vector<8x128xbf16>
      %26 = vector.multi_reduction <maximumf>, %18, %cst_13 [1] : vector<8x8x128xbf16> to vector<8x128xbf16>
      %27 = arith.extf %26 : vector<8x128xbf16> to vector<8x128xf32>
      %28 = arith.maximumf %25, %27 : vector<8x128xf32>
      %c0_14 = arith.constant 0 : index
      %c0_15 = arith.constant 0 : index
      %c0_16 = arith.constant 0 : index
      %29 = vector.load %arg4[%c0_14, %c0_15, %c0_16] : memref<1x8x128xf32, #tpu.memory_space<vmem>>, vector<1x8x128xf32>
      %30 = vector.shape_cast %29 : vector<1x8x128xf32> to vector<8x128xf32>
      %31 = vector.shape_cast %28 : vector<8x128xf32> to vector<1x8x128xf32>
      tpu.vector_store %arg4[%c0_14, %c0_15, %c0_16], %31 {strides = array<i32>} : memref<1x8x128xf32, #tpu.memory_space<vmem>>, vector<1x8x128xf32>,
      %c0_17 = arith.constant 0 : index
      %c0_18 = arith.constant 0 : index
      %c0_19 = arith.constant 0 : index
      %32 = vector.load %arg5[%c0_17, %c0_18, %c0_19] : memref<1x8x128xf32, #tpu.memory_space<vmem>>, vector<1x8x128xf32>
      %33 = vector.shape_cast %32 : vector<1x8x128xf32> to vector<8x128xf32>
      %cst_20 = arith.constant dense<0xFF80> : vector<8x128xbf16>
      %34 = vector.multi_reduction <maximumf>, %23, %cst_20 [1] : vector<8x8x128xbf16> to vector<8x128xbf16>
      %35 = arith.extf %34 : vector<8x128xbf16> to vector<8x128xf32>
      %36 = arith.maximumf %33, %35 : vector<8x128xf32>
      %c0_21 = arith.constant 0 : index
      %c0_22 = arith.constant 0 : index
      %c0_23 = arith.constant 0 : index
      %37 = vector.load %arg5[%c0_21, %c0_22, %c0_23] : memref<1x8x128xf32, #tpu.memory_space<vmem>>, vector<1x8x128xf32>
      %38 = vector.shape_cast %37 : vector<1x8x128xf32> to vector<8x128xf32>
      %39 = vector.shape_cast %36 : vector<8x128xf32> to vector<1x8x128xf32>
      tpu.vector_store %arg5[%c0_21, %c0_22, %c0_23], %39 {strides = array<i32>} : memref<1x8x128xf32, #tpu.memory_space<vmem>>, vector<1x8x128xf32>,
    } else {
    }
    return
  }
  func.func @transform_0(%arg0: i32, %arg1: i32) -> (i32, i32, i32) {
    %c1_i32 = arith.constant 1 : i32
    %0 = arith.muli %arg0, %c1_i32 : i32
    %1 = arith.addi %0, %arg1 : i32
    %c0_i32 = arith.constant 0 : i32
    %c0_i32_0 = arith.constant 0 : i32
    %c0_i32_1 = arith.constant 0 : i32
    return %c0_i32, %1, %c0_i32_0 : i32, i32, i32
  }
  func.func @transform_1(%arg0: i32, %arg1: i32) -> (i32, i32, i32) {
    %c1_i32 = arith.constant 1 : i32
    %0 = arith.muli %arg0, %c1_i32 : i32
    %1 = arith.addi %0, %arg1 : i32
    %c0_i32 = arith.constant 0 : i32
    %c0_i32_0 = arith.constant 0 : i32
    %c0_i32_1 = arith.constant 0 : i32
    return %c0_i32, %1, %c0_i32_0 : i32, i32, i32
  }
  func.func @transform_2(%arg0: i32, %arg1: i32) -> (i32, i32, i32) {
    %c0_i32 = arith.constant 0 : i32
    %c0_i32_0 = arith.constant 0 : i32
    %c0_i32_1 = arith.constant 0 : i32
    return %arg0, %c0_i32, %c0_i32_0 : i32, i32, i32
  }
  func.func @transform_3(%arg0: i32, %arg1: i32) -> (i32, i32, i32) {
    %c0_i32 = arith.constant 0 : i32
    %c0_i32_0 = arith.constant 0 : i32
    %c0_i32_1 = arith.constant 0 : i32
    return %arg0, %c0_i32, %c0_i32_0 : i32, i32, i32
  }
}

module attributes {stable_mosaic.version = 11 : i64} {
  func.func @_finalize_kernel(%arg0: memref<2x8x128xf32, #tpu.memory_space<vmem>>, %arg1: memref<2x8x128xf32, #tpu.memory_space<vmem>>, %arg2: memref<128x128xf32, #tpu.memory_space<vmem>>, %arg3: memref<128x128xf32, #tpu.memory_space<vmem>>, %arg4: memref<1x128xf32, #tpu.memory_space<vmem>>, %arg5: memref<1x128xf32, #tpu.memory_space<vmem>>, %arg6: memref<128x128xf32, #tpu.memory_space<vmem>>, %arg7: memref<1x128xf32, #tpu.memory_space<vmem>>, %arg8: memref<1x128xf32, #tpu.memory_space<vmem>>, %arg9: memref<1x1xf32, #tpu.memory_space<vmem>>) attributes {dimension_semantics = [], scalar_prefetch = 0 : i64, scratch_operands = 0 : i64, tpu.core_type = #tpu.core_type<tc>} {
    %c0 = arith.constant 0 : index
    %c0_0 = arith.constant 0 : index
    %c0_1 = arith.constant 0 : index
    %0 = vector.load %arg0[%c0, %c0_0, %c0_1] : memref<2x8x128xf32, #tpu.memory_space<vmem>>, vector<2x8x128xf32>
    %cst = arith.constant dense<0xFF800000> : vector<8x128xf32>
    %1 = vector.multi_reduction <maximumf>, %0, %cst [0] : vector<2x8x128xf32> to vector<8x128xf32>
    %c0_2 = arith.constant 0 : index
    %c0_3 = arith.constant 0 : index
    %c0_4 = arith.constant 0 : index
    %2 = vector.load %arg1[%c0_2, %c0_3, %c0_4] : memref<2x8x128xf32, #tpu.memory_space<vmem>>, vector<2x8x128xf32>
    %cst_5 = arith.constant dense<0xFF800000> : vector<8x128xf32>
    %3 = vector.multi_reduction <maximumf>, %2, %cst_5 [0] : vector<2x8x128xf32> to vector<8x128xf32>
    %c0_6 = arith.constant 0 : index
    %c0_7 = arith.constant 0 : index
    %4 = vector.load %arg2[%c0_6, %c0_7] : memref<128x128xf32, #tpu.memory_space<vmem>>, vector<128x128xf32>
    %cst_8 = arith.constant dense<0.000000e+00> : vector<8x128xf32>
    %5 = tpu.matmul %1, %4, %cst_8 {dimension_numbers = #tpu.dot_dimension_numbers<[1], [0], [0], [1], [0, 0, 1, 1], [], []>} : vector<8x128xf32>, vector<128x128xf32>, vector<8x128xf32> -> vector<8x128xf32>
    %c0_9 = arith.constant 0 : index
    %c0_10 = arith.constant 0 : index
    %6 = vector.load %arg3[%c0_9, %c0_10] : memref<128x128xf32, #tpu.memory_space<vmem>>, vector<128x128xf32>
    %cst_11 = arith.constant dense<0.000000e+00> : vector<8x128xf32>
    %7 = tpu.matmul %3, %6, %cst_11 {dimension_numbers = #tpu.dot_dimension_numbers<[1], [0], [0], [1], [0, 0, 1, 1], [], []>} : vector<8x128xf32>, vector<128x128xf32>, vector<8x128xf32> -> vector<8x128xf32>
    %c7_i32 = arith.constant 7 : i32
    %8 = tpu.dynamic_rotate %5 by %c7_i32 dim 0 : vector<8x128xf32>, i32 -> vector<8x128xf32>
    %c0_12 = arith.constant 0 : index
    %c0_13 = arith.constant 0 : index
    %9 = vector.load %arg4[%c0_12, %c0_13] : memref<1x128xf32, #tpu.memory_space<vmem>>, vector<1x128xf32>
    %c0_14 = arith.constant 0 : index
    %c0_15 = arith.constant 0 : index
    %10 = vector.load %arg5[%c0_14, %c0_15] : memref<1x128xf32, #tpu.memory_space<vmem>>, vector<1x128xf32>
    %11 = arith.addf %5, %7 : vector<8x128xf32>
    %cst_16 = arith.constant dense<0.000000e+00> : vector<128xf32>
    %12 = vector.multi_reduction <add>, %11, %cst_16 [0] : vector<8x128xf32> to vector<128xf32>
    %13 = vector.shape_cast %12 : vector<128xf32> to vector<1x128xf32>
    %cst_17 = arith.constant 8.000000e+00 : f32
    %14 = vector.broadcast %cst_17 : f32 to vector<1x128xf32>
    %15 = arith.divf %13, %14 : vector<1x128xf32>
    %16 = vector.broadcast %15 : vector<1x128xf32> to vector<8x128xf32>
    %17 = arith.subf %11, %16 : vector<8x128xf32>
    %18 = arith.mulf %17, %17 : vector<8x128xf32>
    %cst_18 = arith.constant dense<0.000000e+00> : vector<128xf32>
    %19 = vector.multi_reduction <add>, %18, %cst_18 [0] : vector<8x128xf32> to vector<128xf32>
    %20 = vector.shape_cast %19 : vector<128xf32> to vector<1x128xf32>
    %cst_19 = arith.constant 8.000000e+00 : f32
    %21 = vector.broadcast %cst_19 : f32 to vector<1x128xf32>
    %22 = arith.divf %20, %21 : vector<1x128xf32>
    %cst_20 = arith.constant 9.99999974E-6 : f32
    %23 = vector.broadcast %cst_20 : f32 to vector<1x128xf32>
    %24 = arith.addf %22, %23 : vector<1x128xf32>
    %25 = math.rsqrt %24 : vector<1x128xf32>
    %26 = vector.broadcast %25 : vector<1x128xf32> to vector<8x128xf32>
    %27 = arith.mulf %17, %26 : vector<8x128xf32>
    %28 = vector.broadcast %9 : vector<1x128xf32> to vector<8x128xf32>
    %29 = arith.mulf %27, %28 : vector<8x128xf32>
    %30 = vector.broadcast %10 : vector<1x128xf32> to vector<8x128xf32>
    %31 = arith.addf %29, %30 : vector<8x128xf32>
    %cst_21 = arith.constant 0.000000e+00 : f32
    %32 = vector.broadcast %cst_21 : f32 to vector<8x128xf32>
    %33 = arith.maximumf %31, %32 : vector<8x128xf32>
    %34 = arith.addf %8, %7 : vector<8x128xf32>
    %cst_22 = arith.constant dense<0.000000e+00> : vector<128xf32>
    %35 = vector.multi_reduction <add>, %34, %cst_22 [0] : vector<8x128xf32> to vector<128xf32>
    %36 = vector.shape_cast %35 : vector<128xf32> to vector<1x128xf32>
    %cst_23 = arith.constant 8.000000e+00 : f32
    %37 = vector.broadcast %cst_23 : f32 to vector<1x128xf32>
    %38 = arith.divf %36, %37 : vector<1x128xf32>
    %39 = vector.broadcast %38 : vector<1x128xf32> to vector<8x128xf32>
    %40 = arith.subf %34, %39 : vector<8x128xf32>
    %41 = arith.mulf %40, %40 : vector<8x128xf32>
    %cst_24 = arith.constant dense<0.000000e+00> : vector<128xf32>
    %42 = vector.multi_reduction <add>, %41, %cst_24 [0] : vector<8x128xf32> to vector<128xf32>
    %43 = vector.shape_cast %42 : vector<128xf32> to vector<1x128xf32>
    %cst_25 = arith.constant 8.000000e+00 : f32
    %44 = vector.broadcast %cst_25 : f32 to vector<1x128xf32>
    %45 = arith.divf %43, %44 : vector<1x128xf32>
    %cst_26 = arith.constant 9.99999974E-6 : f32
    %46 = vector.broadcast %cst_26 : f32 to vector<1x128xf32>
    %47 = arith.addf %45, %46 : vector<1x128xf32>
    %48 = math.rsqrt %47 : vector<1x128xf32>
    %49 = vector.broadcast %48 : vector<1x128xf32> to vector<8x128xf32>
    %50 = arith.mulf %40, %49 : vector<8x128xf32>
    %51 = vector.broadcast %9 : vector<1x128xf32> to vector<8x128xf32>
    %52 = arith.mulf %50, %51 : vector<8x128xf32>
    %53 = vector.broadcast %10 : vector<1x128xf32> to vector<8x128xf32>
    %54 = arith.addf %52, %53 : vector<8x128xf32>
    %cst_27 = arith.constant 0.000000e+00 : f32
    %55 = vector.broadcast %cst_27 : f32 to vector<8x128xf32>
    %56 = arith.maximumf %54, %55 : vector<8x128xf32>
    %57 = tpu.concatenate %33, %56 in 0 : vector<8x128xf32>, vector<8x128xf32> -> vector<16x128xf32>
    %c0_28 = arith.constant 0 : index
    %c0_29 = arith.constant 0 : index
    %58 = vector.load %arg6[%c0_28, %c0_29] : memref<128x128xf32, #tpu.memory_space<vmem>>, vector<128x128xf32>
    %cst_30 = arith.constant dense<0.000000e+00> : vector<16x128xf32>
    %59 = tpu.matmul %57, %58, %cst_30 {dimension_numbers = #tpu.dot_dimension_numbers<[1], [0], [0], [1], [0, 0, 1, 1], [], []>} : vector<16x128xf32>, vector<128x128xf32>, vector<16x128xf32> -> vector<16x128xf32>
    %c0_31 = arith.constant 0 : index
    %c0_32 = arith.constant 0 : index
    %60 = vector.load %arg7[%c0_31, %c0_32] : memref<1x128xf32, #tpu.memory_space<vmem>>, vector<1x128xf32>
    %c0_33 = arith.constant 0 : index
    %c0_34 = arith.constant 0 : index
    %61 = vector.load %arg8[%c0_33, %c0_34] : memref<1x128xf32, #tpu.memory_space<vmem>>, vector<1x128xf32>
    %62 = vector.extract_strided_slice %59 {offsets = [0, 0], sizes = [8, 128], strides = [1, 1]} : vector<16x128xf32> to vector<8x128xf32>
    %cst_35 = arith.constant dense<0.000000e+00> : vector<128xf32>
    %63 = vector.multi_reduction <add>, %62, %cst_35 [0] : vector<8x128xf32> to vector<128xf32>
    %64 = vector.shape_cast %63 : vector<128xf32> to vector<1x128xf32>
    %cst_36 = arith.constant 8.000000e+00 : f32
    %65 = vector.broadcast %cst_36 : f32 to vector<1x128xf32>
    %66 = arith.divf %64, %65 : vector<1x128xf32>
    %67 = vector.broadcast %66 : vector<1x128xf32> to vector<8x128xf32>
    %68 = arith.subf %62, %67 : vector<8x128xf32>
    %69 = arith.mulf %68, %68 : vector<8x128xf32>
    %cst_37 = arith.constant dense<0.000000e+00> : vector<128xf32>
    %70 = vector.multi_reduction <add>, %69, %cst_37 [0] : vector<8x128xf32> to vector<128xf32>
    %71 = vector.shape_cast %70 : vector<128xf32> to vector<1x128xf32>
    %cst_38 = arith.constant 8.000000e+00 : f32
    %72 = vector.broadcast %cst_38 : f32 to vector<1x128xf32>
    %73 = arith.divf %71, %72 : vector<1x128xf32>
    %cst_39 = arith.constant 9.99999974E-6 : f32
    %74 = vector.broadcast %cst_39 : f32 to vector<1x128xf32>
    %75 = arith.addf %73, %74 : vector<1x128xf32>
    %76 = math.rsqrt %75 : vector<1x128xf32>
    %77 = vector.broadcast %76 : vector<1x128xf32> to vector<8x128xf32>
    %78 = arith.mulf %68, %77 : vector<8x128xf32>
    %79 = vector.broadcast %60 : vector<1x128xf32> to vector<8x128xf32>
    %80 = arith.mulf %78, %79 : vector<8x128xf32>
    %81 = vector.broadcast %61 : vector<1x128xf32> to vector<8x128xf32>
    %82 = arith.addf %80, %81 : vector<8x128xf32>
    %83 = vector.extract_strided_slice %59 {offsets = [8, 0], sizes = [8, 128], strides = [1, 1]} : vector<16x128xf32> to vector<8x128xf32>
    %cst_40 = arith.constant dense<0.000000e+00> : vector<128xf32>
    %84 = vector.multi_reduction <add>, %83, %cst_40 [0] : vector<8x128xf32> to vector<128xf32>
    %85 = vector.shape_cast %84 : vector<128xf32> to vector<1x128xf32>
    %cst_41 = arith.constant 8.000000e+00 : f32
    %86 = vector.broadcast %cst_41 : f32 to vector<1x128xf32>
    %87 = arith.divf %85, %86 : vector<1x128xf32>
    %88 = vector.broadcast %87 : vector<1x128xf32> to vector<8x128xf32>
    %89 = arith.subf %83, %88 : vector<8x128xf32>
    %90 = arith.mulf %89, %89 : vector<8x128xf32>
    %cst_42 = arith.constant dense<0.000000e+00> : vector<128xf32>
    %91 = vector.multi_reduction <add>, %90, %cst_42 [0] : vector<8x128xf32> to vector<128xf32>
    %92 = vector.shape_cast %91 : vector<128xf32> to vector<1x128xf32>
    %cst_43 = arith.constant 8.000000e+00 : f32
    %93 = vector.broadcast %cst_43 : f32 to vector<1x128xf32>
    %94 = arith.divf %92, %93 : vector<1x128xf32>
    %cst_44 = arith.constant 9.99999974E-6 : f32
    %95 = vector.broadcast %cst_44 : f32 to vector<1x128xf32>
    %96 = arith.addf %94, %95 : vector<1x128xf32>
    %97 = math.rsqrt %96 : vector<1x128xf32>
    %98 = vector.broadcast %97 : vector<1x128xf32> to vector<8x128xf32>
    %99 = arith.mulf %89, %98 : vector<8x128xf32>
    %100 = vector.broadcast %60 : vector<1x128xf32> to vector<8x128xf32>
    %101 = arith.mulf %99, %100 : vector<8x128xf32>
    %102 = vector.broadcast %61 : vector<1x128xf32> to vector<8x128xf32>
    %103 = arith.addf %101, %102 : vector<8x128xf32>
    %cst_45 = arith.constant 0.000000e+00 : f32
    %104 = vector.broadcast %cst_45 : f32 to vector<8x128xf32>
    %105 = arith.subf %104, %82 : vector<8x128xf32>
    %cst_46 = arith.constant 0.000000e+00 : f32
    %106 = vector.broadcast %cst_46 : f32 to vector<8x128xf32>
    %107 = arith.maximumf %105, %106 : vector<8x128xf32>
    %108 = math.absf %105 : vector<8x128xf32>
    %cst_47 = arith.constant 0.000000e+00 : f32
    %109 = vector.broadcast %cst_47 : f32 to vector<8x128xf32>
    %110 = arith.subf %109, %108 : vector<8x128xf32>
    %111 = math.exp %110 : vector<8x128xf32>
    %112 = math.log1p %111 : vector<8x128xf32>
    %113 = arith.addf %107, %112 : vector<8x128xf32>
    %114 = vector.shape_cast %113 : vector<8x128xf32> to vector<1x8x128xf32>
    %cst_48 = arith.constant dense<0.000000e+00> : vector<1xf32>
    %115 = vector.multi_reduction <add>, %114, %cst_48 [1, 2] : vector<1x8x128xf32> to vector<1xf32>
    %116 = vector.shape_cast %115 : vector<1xf32> to vector<1x1x1xf32>
    %117 = vector.extract %116[0, 0, 0] : f32 from vector<1x1x1xf32>
    %cst_49 = arith.constant 1.024000e+03 : f32
    %118 = arith.divf %117, %cst_49 : f32
    %cst_50 = arith.constant 0.000000e+00 : f32
    %119 = arith.subf %cst_50, %118 : f32
    %cst_51 = arith.constant 0.000000e+00 : f32
    %120 = vector.broadcast %cst_51 : f32 to vector<8x128xf32>
    %121 = arith.maximumf %103, %120 : vector<8x128xf32>
    %122 = math.absf %103 : vector<8x128xf32>
    %cst_52 = arith.constant 0.000000e+00 : f32
    %123 = vector.broadcast %cst_52 : f32 to vector<8x128xf32>
    %124 = arith.subf %123, %122 : vector<8x128xf32>
    %125 = math.exp %124 : vector<8x128xf32>
    %126 = math.log1p %125 : vector<8x128xf32>
    %127 = arith.addf %121, %126 : vector<8x128xf32>
    %128 = vector.shape_cast %127 : vector<8x128xf32> to vector<1x8x128xf32>
    %cst_53 = arith.constant dense<0.000000e+00> : vector<1xf32>
    %129 = vector.multi_reduction <add>, %128, %cst_53 [1, 2] : vector<1x8x128xf32> to vector<1xf32>
    %130 = vector.shape_cast %129 : vector<1xf32> to vector<1x1x1xf32>
    %131 = vector.extract %130[0, 0, 0] : f32 from vector<1x1x1xf32>
    %cst_54 = arith.constant 1.024000e+03 : f32
    %132 = arith.divf %131, %cst_54 : f32
    %133 = arith.subf %132, %119 : f32
    %134 = vector.broadcast %133 : f32 to vector<1x1xf32>
    %c0_55 = arith.constant 0 : index
    %c0_56 = arith.constant 0 : index
    %135 = vector.load %arg9[%c0_55, %c0_56] : memref<1x1xf32, #tpu.memory_space<vmem>>, vector<1x1xf32>
    tpu.vector_store %arg9[%c0_55, %c0_56], %134 {strides = array<i32>} : memref<1x1xf32, #tpu.memory_space<vmem>>, vector<1x1xf32>,
    return
  }
}

</mosaic_0001>

<bundles_post_ra>
// kernel: deep_infomax_forward.3
= control target key start
LH: loop header
LB: loop body
LE: loop exit
PB: predicated region body
PF: predicated region fallthrough
CT: control target
= control target key end

     0   :  { %v783_v3 = vmov 0.0|0.0   ;;  %vm784_vm0 = vmmov 0   ;;  %v785_v11 = vmov 0.0   ;;  %s1033_s0 = inlined_call_operand.vmem [shape: f32[2,8,128], index: 0, kind: input, shape index: {}]   ;;  %s1034_s1 = inlined_call_operand.vmem [shape: f32[2,8,128], index: 1, kind: input, shape index: {}]   ;;  %s1035_s2 = inlined_call_operand.vmem [shape: f32[128,128], index: 2, kind: input, shape index: {}]   ;;  %s1036_s3 = inlined_call_operand.vmem [shape: f32[128,128], index: 3, kind: input, shape index: {}]   ;;  %s1037_s4 = inlined_call_operand.vmem [shape: f32[1,128], index: 4, kind: input, shape index: {}]   ;;  %s1038_s5 = inlined_call_operand.vmem [shape: f32[1,128], index: 5, kind: input, shape index: {}]   ;;  %s1039_s6 = inlined_call_operand.vmem [shape: f32[128,128], index: 6, kind: input, shape index: {}]   ;;  %s1040_s7 = inlined_call_operand.vmem [shape: f32[1,128], index: 7, kind: input, shape index: {}]   ;;  %s1041_s8 = inlined_call_operand.vmem [shape: f32[1,128], index: 8, kind: input, shape index: {}]   ;;  %s1042_s9 = inlined_call_operand.hbm [shape: f32[1,1], index: 9, kind: output, shape index: {}]  }
   0x1   :  { %v39_v0 = vld [vmem:[%s1035_s2] sm:$0xff]  ;;  %v40_v1 = vld [vmem:[%s1035_s2 + $0x8] sm:$0xff]  ;;  %655 = vmatprep.subr.bf16.mxu0 %v783_v3  ;;  %679 = vmatprep.subr.bf16.mxu1 %v783_v3  ;;  %v41_v6 = vld [vmem:[%s1035_s2 + $0x10] sm:$0xff] }
   0x2   :  { %v125_v2 = vld [vmem:[%s1036_s3] sm:$0xff]  ;;  %v656_v4 = vpack.c.bf16 %v40_v1, %v39_v0  ;;  %v126_v5 = vld [vmem:[%s1036_s3 + $0x8] sm:$0xff]  ;;  %v42_v7 = vld [vmem:[%s1035_s2 + $0x18] sm:$0xff]  ;;  %582 = vmatprep.mubr.msk.f32.mxu0 %vm784_vm0, %v785_v11  ;;  %617 = vmatprep.mubr.msk.f32.mxu1 %vm784_vm0, %v785_v11 }
   0x3   :  { %v680_v8 = vpack.c.bf16 %v126_v5, %v125_v2  ;;  %v127_v9 = vld [vmem:[%s1036_s3 + $0x10] sm:$0xff]  ;;  %v128_v10 = vld [vmem:[%s1036_s3 + $0x18] sm:$0xff]  ;;  %v659_v12 = vpack.c.bf16 %v42_v7, %v41_v6  ;;  %v43_v14 = vld [vmem:[%s1035_s2 + $0x20] sm:$0xff] }
   0x4   :  { %657 = vmatpush3.bf16.msra.mxu0 %v656_v4  ;;  %v683_v13 = vpack.c.bf16 %v128_v10, %v127_v9  ;;  %v44_v15 = vld [vmem:[%s1035_s2 + $0x28] sm:$0xff]  ;;  %v129_v16 = vld [vmem:[%s1036_s3 + $0x20] sm:$0xff]  ;;  %v45_v20 = vld [vmem:[%s1035_s2 + $0x30] sm:$0xff] }
   0x5   :  { %681 = vmatpush3.bf16.msra.mxu1 %v680_v8  ;;  %658 = vmatprep.subr.bf16.mxu0 %v783_v3  ;;  %v130_v17 = vld [vmem:[%s1036_s3 + $0x28] sm:$0xff]  ;;  %v662_v18 = vpack.c.bf16 %v44_v15, %v43_v14  ;;  %v46_v21 = vld [vmem:[%s1035_s2 + $0x38] sm:$0xff]  ;;  %v131_v22 = vld [vmem:[%s1036_s3 + $0x30] sm:$0xff] }
   0x6   :  { %682 = vmatprep.subr.bf16.mxu1 %v783_v3  ;;  %v686_v19 = vpack.c.bf16 %v130_v17, %v129_v16  ;;  %v132_v23 = vld [vmem:[%s1036_s3 + $0x38] sm:$0xff]  ;;  %v665_v24 = vpack.c.bf16 %v46_v21, %v45_v20  ;;  %v47_v26 = vld [vmem:[%s1035_s2 + $0x40] sm:$0xff]  ;;  %v48_v27 = vld [vmem:[%s1035_s2 + $0x48] sm:$0xff] }
   0x7   :  { %v689_v25 = vpack.c.bf16 %v132_v23, %v131_v22 }
   0x8   :  { %660 = vmatpush3.bf16.msra.mxu0 %v659_v12 }
   0x9   :  { %684 = vmatpush3.bf16.msra.mxu1 %v683_v13  ;;  %661 = vmatprep.subr.bf16.mxu0 %v783_v3 }
   0xa   :  { %685 = vmatprep.subr.bf16.mxu1 %v783_v3 }
   0xc   :  { %663 = vmatpush3.bf16.msra.mxu0 %v662_v18 }
   0xd   :  { %687 = vmatpush3.bf16.msra.mxu1 %v686_v19  ;;  %664 = vmatprep.subr.bf16.mxu0 %v783_v3 }
   0xe   :  { %14 = vsyncpa [#allocation3], 0  ;;  %688 = vmatprep.subr.bf16.mxu1 %v783_v3  ;;  %v133_v28 = vld [vmem:[%s1036_s3 + $0x40] sm:$0xff]  ;;  %v134_v29 = vld [vmem:[%s1036_s3 + $0x48] sm:$0xff]  ;;  %v668_v30 = vpack.c.bf16 %v48_v27, %v47_v26  ;;  %s786_s27 = smov [#allocation2]   ;;  %vm478_vm3 = vcmask 0  }
   0xf   :  { %v692_v31 = vpack.c.bf16 %v134_v29, %v133_v28  ;;  %v49_v32 = vld [vmem:[%s1035_s2 + $0x50] sm:$0xff]  ;;  %v50_v33 = vld [vmem:[%s1035_s2 + $0x58] sm:$0xff]  ;;  %v51_v38 = vld [vmem:[%s1035_s2 + $0x60] sm:$0xff]  ;;  %s486_s28 = sshll.u32 %s786_s27, 4  ;;  %s487_s28 = int_to_ptr.vmem [resolvable:$true] %s486_s28 }
  0x10   :  { %666 = vmatpush3.bf16.msra.mxu0 %v665_v24  ;;  %v135_v34 = vld [vmem:[%s1036_s3 + $0x50] sm:$0xff]  ;;  %v136_v35 = vld [vmem:[%s1036_s3 + $0x58] sm:$0xff]  ;;  %v671_v36 = vpack.c.bf16 %v50_v33, %v49_v32  ;;  %v52_v39 = vld [vmem:[%s1035_s2 + $0x68] sm:$0xff]  ;;  %s759_s11 = scalar_lea.vmem %s487_s28, 16  ;;  %s763_s12 = scalar_lea.vmem %s487_s28, 32 }
  0x11   :  { %690 = vmatpush3.bf16.msra.mxu1 %v689_v25  ;;  %667 = vmatprep.subr.bf16.mxu0 %v783_v3  ;;  %v695_v37 = vpack.c.bf16 %v136_v35, %v135_v34  ;;  %v137_v40 = vld [vmem:[%s1036_s3 + $0x60] sm:$0xff]  ;;  %v138_v41 = vld [vmem:[%s1036_s3 + $0x68] sm:$0xff]  ;;  %v674_v42 = vpack.c.bf16 %v52_v39, %v51_v38  ;;  %v53_v44 = vld [vmem:[%s1035_s2 + $0x70] sm:$0xff]  ;;  %p760_p0 = scmp.ne.s32.totalorder %s487_s28, %s759_s11  ;;  %p764_p1 = scmp.lt.s32.totalorder %s487_s28, %s487_s28 }
  0x12   :  { %691 = vmatprep.subr.bf16.mxu1 %v783_v3  ;;  %v698_v43 = vpack.c.bf16 %v138_v41, %v137_v40  ;;  %v54_v45 = vld [vmem:[%s1035_s2 + $0x78] sm:$0xff]  ;;  %v139_v46 = vld [vmem:[%s1036_s3 + $0x70] sm:$0xff]  ;;  %v33_v49 = vld [vmem:[%s1033_s0] sm:$0xff]  ;;  %p765_p2 = scmp.lt.s32.totalorder %s763_s12, %s759_s11 }
  0x13   :  { %v140_v47 = vld [vmem:[%s1036_s3 + $0x78] sm:$0xff]  ;;  %v677_v48 = vpack.c.bf16 %v54_v45, %v53_v44  ;;  %v34_v50 = vld [vmem:[%s1033_s0 + $0x8] sm:$0xff]  ;;  %v36_v52 = vld [vmem:[%s1034_s1] sm:$0xff] }
  0x14   :  { %669 = vmatpush3.bf16.msra.mxu0 %v668_v30  ;;  %v701_v51 = vpack.c.bf16 %v140_v47, %v139_v46  ;;  %v37_v53 = vld [vmem:[%s1034_s1 + $0x8] sm:$0xff]  ;;  %v35_v54 = vmax.f32 %v33_v49, %v34_v50  ;;  %v273_v56 = vld [vmem:[%s1039_s6] sm:$0xff]  ;;  %v275_v59 = vld [vmem:[%s1039_s6 + $0x10] sm:$0xff]  ;;  %p766_p3 = por %p765_p2, %p764_p1 }
  0x15   :  { %693 = vmatpush3.bf16.msra.mxu1 %v692_v31  ;;  %670 = vmatprep.subr.bf16.mxu0 %v783_v3  ;;  %v38_v55 = vmax.f32 %v36_v52, %v37_v53  ;;  %v274_v57 = vld [vmem:[%s1039_s6 + $0x8] sm:$0xff]  ;;  %v276_v60 = vld [vmem:[%s1039_s6 + $0x18] sm:$0xff]  ;;  %v277_v62 = vld [vmem:[%s1039_s6 + $0x20] sm:$0xff] }
  0x16   :  { %694 = vmatprep.subr.bf16.mxu1 %v783_v3  ;;  %v703_v58 = vpack.c.bf16 %v274_v57, %v273_v56  ;;  %v707_v61 = vpack.c.bf16 %v276_v60, %v275_v59  ;;  %v278_v63 = vld [vmem:[%s1039_s6 + $0x28] sm:$0xff]  ;;  %v279_v1 = vld [vmem:[%s1039_s6 + $0x30] sm:$0xff]  ;;  %v280_v2 = vld [vmem:[%s1039_s6 + $0x38] sm:$0xff]  ;;  %p767_p4 = pnand %p766_p3, %p760_p0 }
  0x17   :  { %v711_v0 = vpack.c.bf16 %v278_v63, %v277_v62  ;;  %v281_v4 = vld [vmem:[%s1039_s6 + $0x40] sm:$0xff]  ;;  %v282_v5 = vld [vmem:[%s1039_s6 + $0x48] sm:$0xff]  ;;  %v283_v7 = vld [vmem:[%s1039_s6 + $0x50] sm:$0xff] }
  0x18   :  { %672 = vmatpush3.bf16.msra.mxu0 %v671_v36  ;;  %v719_v6 = vpack.c.bf16 %v282_v5, %v281_v4  ;;  %v284_v8 = vld [vmem:[%s1039_s6 + $0x58] sm:$0xff]  ;;  %v285_v10 = vld [vmem:[%s1039_s6 + $0x60] sm:$0xff]  ;;  %v286_v11 = vld [vmem:[%s1039_s6 + $0x68] sm:$0xff] }
  0x19   :  { %696 = vmatpush3.bf16.msra.mxu1 %v695_v37  ;;  %673 = vmatprep.subr.bf16.mxu0 %v783_v3  ;;  %v723_v9 = vpack.c.bf16 %v284_v8, %v283_v7  ;;  %v727_v12 = vpack.c.bf16 %v286_v11, %v285_v10  ;;  %v287_v13 = vld [vmem:[%s1039_s6 + $0x70] sm:$0xff]  ;;  %v288_v14 = vld [vmem:[%s1039_s6 + $0x78] sm:$0xff]  ;;  %v495_v62 = vld [vmem:[%s1038_s5] ss:$0 sm:$0xff] }
  0x1a   :  { %697 = vmatprep.subr.bf16.mxu1 %v783_v3  ;;  %v731_v15 = vpack.c.bf16 %v288_v14, %v287_v13 }
  0x1c   :  { %675 = vmatpush3.bf16.msra.mxu0 %v674_v42 }
  0x1d   :  { %699 = vmatpush3.bf16.msra.mxu1 %v698_v43  ;;  %676 = vmatprep.subr.bf16.mxu0 %v783_v3 }
  0x1e   :  { %700 = vmatprep.subr.bf16.mxu1 %v783_v3  ;;  %v715_v3 = vpack.c.bf16 %v280_v2, %v279_v1 }
  0x20   :  { %678 = vmatpush3.bf16.msra.mxu0 %v677_v48 }
  0x21   :  { %702 = vmatpush3.bf16.msra.mxu1 %v701_v51  ;;  %704 = vmatprep.subr.bf16.mxu0 %v703_v58 }
  0x23   :  { %583 = vmatmul.mubr.f32.vlgmr.msra.gmra.mrb[0].mxu0 %v35_v54 }
  0x24   :  { %618 = vmatmul.mubr.f32.vlgmr.msra.gmra.mrb[0].mxu1 %v38_v55  ;;  %706 = vmatpush3.bf16.msra.mxu0 %v703_v58  ;;  %v494_v58 = vld [vmem:[%s1037_s4] ss:$0 sm:$0xff] }
  0x25   :  { %708 = vmatprep.subr.bf16.mxu0 %v707_v61 }
  0x28   :  { %710 = vmatpush3.bf16.msra.mxu0 %v707_v61 }
  0x29   :  { %712 = vmatprep.subr.bf16.mxu0 %v711_v0 }
  0x2c   :  { %714 = vmatpush3.bf16.msra.mxu0 %v711_v0 }
  0x2d   :  { %716 = vmatprep.subr.bf16.mxu0 %v715_v3 }
  0x30   :  { %718 = vmatpush3.bf16.msra.mxu0 %v715_v3 }
  0x31   :  { %720 = vmatprep.subr.bf16.mxu0 %v719_v6 }
  0x34   :  { %722 = vmatpush3.bf16.msra.mxu0 %v719_v6 }
  0x35   :  { %724 = vmatprep.subr.bf16.mxu0 %v723_v9 }
  0x38   :  { %726 = vmatpush3.bf16.msra.mxu0 %v723_v9 }
  0x39   :  { %728 = vmatprep.subr.bf16.mxu0 %v727_v12 }
  0x3c   :  { %730 = vmatpush3.bf16.msra.mxu0 %v727_v12 }
  0x3d   :  { %732 = vmatprep.subr.bf16.mxu0 %v731_v15 }
  0x40   :  { %734 = vmatpush3.bf16.msra.mxu0 %v731_v15 }
  0xf6   :  { %v121_v16 = vpop.f32.mrb[0].mxu0 }
  0xf7   :  { %v211_v17 = vrot.slane %v121_v16, 1  ;;  %v207_v18 = vpop.f32.mrb[0].mxu1  ;;  %v584_v19 = vpop.f32.mrb[1].mxu0 }
  0xf8   :  { %v214_v20 = vadd.f32 %v207_v18, %v121_v16  ;;  %v619_v21 = vpop.f32.mrb[1].mxu1 }
  0xf9   :  { %v250_v22 = vadd.f32 %v211_v17, %v207_v18 }
  0xfa   :  { %v215_v23 = vrot.slane %v214_v20, 4 }
  0xfb   :  { %v251_v24 = vrot.slane %v250_v22, 4 }
  0xfc   :  { %v216_v25 = vadd.f32 %v215_v23, %v214_v20 }
  0xfd   :  { %v252_v26 = vadd.f32 %v251_v24, %v250_v22 }
  0xfe   :  { %v217_v27 = vrot.slane %v216_v25, 2 }
  0xff   :  { %v253_v28 = vrot.slane %v252_v26, 2 }
 0x100   :  { %v218_v29 = vadd.f32 %v217_v27, %v216_v25 }
 0x101   :  { %v254_v30 = vadd.f32 %v253_v28, %v252_v26 }
 0x102   :  { %v219_v31 = vrot.slane %v218_v29, 1 }
 0x103   :  { %v255_v32 = vrot.slane %v254_v30, 1 }
 0x104   :  { %v220_v33 = vadd.f32 %v219_v31, %v218_v29 }
 0x105   :  { %v256_v34 = vadd.f32 %v255_v32, %v254_v30 }
 0x106   :  { %v222_v35 = vmul.f32 0.125, %v220_v33 }
 0x107   :  { %v257_v36 = vmul.f32 0.125, %v256_v34 }
 0x108   :  { %v223_v37 = vsub.f32 %v214_v20, %v222_v35 }
 0x109   :  { %v258_v38 = vsub.f32 %v250_v22, %v257_v36 }
 0x10a   :  { %v224_v39 = vmul.f32 %v223_v37, %v223_v37 }
 0x10b   :  { %v259_v40 = vmul.f32 %v258_v38, %v258_v38 }
 0x10c   :  { %v225_v41 = vrot.slane %v224_v39, 4 }
 0x10d   :  { %v260_v42 = vrot.slane %v259_v40, 4 }
 0x10e   :  { %v226_v43 = vadd.f32 %v225_v41, %v224_v39 }
 0x10f   :  { %v261_v44 = vadd.f32 %v260_v42, %v259_v40  ;;  %v496_v42 = vld [vmem:[%s1040_s7] ss:$0 sm:$0xff] }
 0x110   :  { %v227_v45 = vrot.slane %v226_v43, 2 }
 0x111   :  { %v262_v46 = vrot.slane %v261_v44, 2 }
 0x112   :  { %v228_v47 = vadd.f32 %v227_v45, %v226_v43 }
 0x113   :  { %v263_v48 = vadd.f32 %v262_v46, %v261_v44  ;;  %v497_v46 = vld [vmem:[%s1041_s8] ss:$0 sm:$0xff] }
 0x114   :  { %v229_v49 = vrot.slane %v228_v47, 1 }
 0x115   :  { %v264_v50 = vrot.slane %v263_v48, 1 }
 0x116   :  { %v230_v51 = vadd.f32 %v229_v49, %v228_v47 }
 0x117   :  { %v265_v52 = vadd.f32 %v264_v50, %v263_v48 }
 0x118   :  { %v231_v53 = vmul.f32 0.125, %v230_v51 }
 0x119   :  { %v266_v54 = vmul.f32 0.125, %v265_v52 }
 0x11a   :  { %v232_v55 = vadd.f32 1e-05, %v231_v53 }
 0x11b   :  { %v267_v56 = vadd.f32 1e-05, %v266_v54 }
 0x11c   :  { %743 = vrsqrt.f32 %v232_v55 }
 0x11d   :  { %745 = vrsqrt.f32 %v267_v56 }
 0x126   :  { %v744_v57 = vpop.eup %743 }
 0x127   :  { %v746_v59 = vpop.eup %745  ;;  %v234_v60 = vmul.f32 %v744_v57, %v223_v37 }
 0x128   :  { %v269_v61 = vmul.f32 %v746_v59, %v258_v38 }
 0x129   :  { %v241_v63 = vmul.f32 %v494_v58, %v234_v60 }
 0x12a   :  { %v270_v0 = vmul.f32 %v494_v58, %v269_v61 }
 0x12b   :  { %v248_v1 = vadd.f32 %v495_v62, %v241_v63 }
 0x12c   :  { %v271_v2 = vadd.f32 %v495_v62, %v270_v0 }
 0x12d   :  { %v249_v3 = vmax.f32 %v248_v1, 0.0 }
 0x12e   :  { %v272_v4 = vmax.f32 %v271_v2, 0.0 }
 0x12f   :  { %652 = vmatprep.mubr.f32.mxu0 %v249_v3 }
 0x130   :  { %653 = vmatmul.mubr.f32.vlgmr.msra.gmra.mrb[2].mxu0 %v272_v4 }
 0x203   :  { %v654_v5 = vpop.f32.mrb[2].mxu0 }
 0x204   :  { %v399_v6 = vrot.slane %v654_v5, 4  ;;  %v355_v7 = vpop.f32.mrb[3].mxu0 }
 0x205   :  { %v366_v8 = vrot.slane %v355_v7, 4 }
 0x206   :  { %v400_v9 = vadd.f32 %v654_v5, %v399_v6 }
 0x207   :  { %v367_v10 = vadd.f32 %v366_v8, %v355_v7 }
 0x208   :  { %v401_v11 = vrot.slane %v400_v9, 2 }
 0x209   :  { %v368_v12 = vrot.slane %v367_v10, 2 }
 0x20a   :  { %v402_v13 = vadd.f32 %v401_v11, %v400_v9 }
 0x20b   :  { %v369_v14 = vadd.f32 %v368_v12, %v367_v10 }
 0x20c   :  { %v403_v15 = vrot.slane %v402_v13, 1 }
 0x20d   :  { %v370_v16 = vrot.slane %v369_v14, 1 }
 0x20e   :  { %v404_v17 = vadd.f32 %v403_v15, %v402_v13 }
 0x20f   :  { %v371_v18 = vadd.f32 %v370_v16, %v369_v14 }
 0x210   :  { %v405_v19 = vmul.f32 0.125, %v404_v17 }
 0x211   :  { %v372_v20 = vmul.f32 0.125, %v371_v18 }
 0x212   :  { %v406_v21 = vsub.f32 %v654_v5, %v405_v19 }
 0x213   :  { %v373_v22 = vsub.f32 %v355_v7, %v372_v20 }
 0x214   :  { %v407_v23 = vmul.f32 %v406_v21, %v406_v21 }
 0x215   :  { %v374_v24 = vmul.f32 %v373_v22, %v373_v22 }
 0x216   :  { %v408_v25 = vrot.slane %v407_v23, 4 }
 0x217   :  { %v375_v26 = vrot.slane %v374_v24, 4 }
 0x218   :  { %v409_v27 = vadd.f32 %v408_v25, %v407_v23 }
 0x219   :  { %v376_v28 = vadd.f32 %v375_v26, %v374_v24 }
 0x21a   :  { %v410_v29 = vrot.slane %v409_v27, 2 }
 0x21b   :  { %v377_v30 = vrot.slane %v376_v28, 2 }
 0x21c   :  { %v411_v31 = vadd.f32 %v410_v29, %v409_v27 }
 0x21d   :  { %v378_v32 = vadd.f32 %v377_v30, %v376_v28 }
 0x21e   :  { %v412_v33 = vrot.slane %v411_v31, 1 }
 0x21f   :  { %v379_v34 = vrot.slane %v378_v32, 1 }
 0x220   :  { %v413_v35 = vadd.f32 %v412_v33, %v411_v31 }
 0x221   :  { %v380_v36 = vadd.f32 %v379_v34, %v378_v32 }
 0x222   :  { %v414_v37 = vmul.f32 0.125, %v413_v35 }
 0x223   :  { %v381_v38 = vmul.f32 0.125, %v380_v36 }
 0x224   :  { %v415_v39 = vadd.f32 1e-05, %v414_v37 }
 0x225   :  { %v382_v40 = vadd.f32 1e-05, %v381_v38 }
 0x226   :  { %747 = vrsqrt.f32 %v415_v39 }
 0x227   :  { %749 = vrsqrt.f32 %v382_v40 }
 0x230   :  { %v748_v41 = vpop.eup %747 }
 0x231   :  { %v750_v43 = vpop.eup %749  ;;  %v417_v44 = vmul.f32 %v748_v41, %v406_v21 }
 0x232   :  { %v384_v45 = vmul.f32 %v750_v43, %v373_v22 }
 0x233   :  { %v418_v47 = vmul.f32 %v496_v42, %v417_v44 }
 0x234   :  { %v391_v48 = vmul.f32 %v496_v42, %v384_v45 }
 0x235   :  { %v419_v49 = vadd.f32 %v497_v46, %v418_v47 }
 0x236   :  { %v398_v50 = vadd.f32 %v497_v46, %v391_v48 }
 0x237   :  { %v450_v51 = vand.u32 2147483647, %v419_v49  ;;  %v449_v14 = vmax.f32 %v419_v49, 0.0 }
 0x238   :  { %v420_v52 = vsub.f32 0.0, %v398_v50 }
 0x239   :  { %v451_v53 = vsub.f32 0.0, %v450_v51 }
 0x23a   :  { %v422_v54 = vand.u32 2147483647, %v420_v52  ;;  %v421_v9 = vmax.f32 %v420_v52, 0.0 }
 0x23b   :  { %v452_v55 = vmul.f32 1.442695, %v451_v53 }
 0x23c   :  { %v423_v56 = vsub.f32 0.0, %v422_v54 }
 0x23d   :  { %751 = vpow2.f32 %v452_v55 }
 0x23e   :  { %v424_v57 = vmul.f32 1.442695, %v423_v56 }
 0x240   :  { %753 = vpow2.f32 %v424_v57 }
 0x247   :  { %v752_v58 = vpop.eup %751 }
 0x248   :  { %v454_v59 = vadd.f32 1.0, %v752_v58  ;;  %v457_v63 = vmul.f32 -0.5, %v752_v58  ;;  %v460_v5 = vand.u32 2147483647, %v752_v58 }
 0x24a   :  { %v754_v60 = vpop.eup %753  ;;  %755 = vlog2.f32 %v454_v59  ;;  %v458_v3 = vadd.f32 1.0, %v457_v63  ;;  %vm461_vm2 = vcmp.lt.f32.partialorder %v460_v5, 0.0004427343 }
 0x24b   :  { %v426_v61 = vadd.f32 1.0, %v754_v60  ;;  %v429_v62 = vmul.f32 -0.5, %v754_v60  ;;  %v432_v2 = vand.u32 2147483647, %v754_v60 }
 0x24c   :  { %v459_v11 = vmul.f32 %v752_v58, %v458_v3 }
 0x24d   :  { %757 = vlog2.f32 %v426_v61  ;;  %v430_v0 = vadd.f32 1.0, %v429_v62  ;;  %vm433_vm1 = vcmp.lt.f32.partialorder %v432_v2, 0.0004427343 }
 0x24f   :  { %v431_v7 = vmul.f32 %v754_v60, %v430_v0 }
 0x254   :  { %v756_v1 = vpop.eup %755 }
 0x255   :  { %v456_v8 = vmul.f32 0.6931472, %v756_v1 }
 0x257   :  { %v758_v4 = vpop.eup %757  ;;  %v462_v13 = vsel %vm461_vm2, %v459_v11, %v456_v8 }
 0x258   :  { %v428_v6 = vmul.f32 0.6931472, %v758_v4  ;;  %v463_v15 = vadd.f32 %v462_v13, %v449_v14 }
 0x25a   :  { %v434_v10 = vsel %vm433_vm1, %v431_v7, %v428_v6 }
 0x25b   :  { %v435_v12 = vadd.f32 %v434_v10, %v421_v9 }
 0x25d   :  { %436 = vadd.xlane.f32.xlu0 %v435_v12 }
 0x261   :  { %464 = vadd.xlane.f32.xlu0 %v463_v15 }
 0x2ea   :  { %v437_v16 = vpop.xlane.xlu0 %436 }
 0x2eb   :  { %v438_v17 = vrot.slane %v437_v16, 4 }
 0x2ed   :  { %v439_v18 = vadd.f32 %v438_v17, %v437_v16 }
 0x2ee   :  { %v465_v19 = vpop.xlane.xlu0 %464 }
 0x2ef   :  { %v440_v20 = vrot.slane %v439_v18, 2  ;;  %v466_v21 = vrot.slane %v465_v19, 4 }
 0x2f1   :  { %v467_v22 = vadd.f32 %v466_v21, %v465_v19  ;;  %v441_v23 = vadd.f32 %v440_v20, %v439_v18 }
 0x2f3   :  { %v468_v24 = vrot.slane %v467_v22, 2  ;;  %v442_v25 = vrot.slane %v441_v23, 1 }
 0x2f5   :  { %v469_v26 = vadd.f32 %v468_v24, %v467_v22  ;;  %v443_v27 = vadd.f32 %v442_v25, %v441_v23 }
 0x2f7   :  { %735 = vpush %v443_v27  ;;  %v470_v28 = vrot.slane %v469_v26, 1 }
 0x2f9   :  { %v471_v29 = vadd.f32 %v470_v28, %v469_v26 }
 0x2fb   :  { %737 = vpush %v471_v29 }
 0x328   :  { %s736_s7 = spop %735 }
 0x329   :  { %s447_s8 = smul.f32 0.0009765625, %s736_s7 }
 0x32b   :  { %s448_s29 = ssub.f32 0.0, %s447_s8 }
 0x32c   :  { %s738_s26 = spop %737 }
 0x32d   :  { %s475_s30 = smul.f32 0.0009765625, %s738_s26 }
 0x32f   :  { %s476_s10 = ssub.f32 %s475_s30, %s448_s29 }
 0x331   :  { %v477_v30 = vstv %s476_s10 }
 0x332   :  { %479 = vst.msk [vmem:[#allocation2] sm:$0x1] %vm478_vm3, %v477_v30 }
 0x333   :  { %770 = shalt.err (!%p767_p4)
}
 0x334   :  { %s771_s14 = scalar_lea.hbm %s1042_s9, 16 }
 0x335   :  { %p772_p5 = scmp.ne.s32.totalorder %s1042_s9, %s771_s14  ;;  %p775_p6 = scmp.lt.u32.totalorder %s771_s14, %s1042_s9 }
 0x337   :  { %p777_p7 = pnand %p775_p6, %p772_p5 }
 0x339   :  { %780 = shalt.err (!%p777_p7)
}
 0x33a   :  { %489 = dma.vmem_to_hbm [thread:$0]  %s487_s28, 16, %s1042_s9, [#allocation3]  }
 0x33b   :  { %781 = dma.done.wait [#allocation3], 16  }
 0x33c   :  { %782 = vsyncadd [#allocation3], 4294967280 }
 0x33d   :  { %493 = vsyncpa [#allocation3], 1 }

// kernel: deep_infomax_forward.2
= control target key start
LH: loop header
LB: loop body
LE: loop exit
PB: predicated region body
PF: predicated region fallthrough
CT: control target
= control target key end

     0   :  { %s1243_s12 = smov 0   ;;  %s1245_s13 = smov 0   ;;  %s1559_s0 = inlined_call_operand.vmem [shape: bf16[8,20,128], index: 0, kind: input, shape index: {}]   ;;  %s1560_s1 = inlined_call_operand.vmem [shape: bf16[8,20,128], index: 1, kind: input, shape index: {}]   ;;  %s1561_s2 = inlined_call_operand.vmem [shape: f32[2,8,128], index: 2, kind: output, shape index: {0}]   ;;  %s1562_s3 = inlined_call_operand.vmem [shape: f32[2,8,128], index: 3, kind: output, shape index: {1}]  }
   0x1   :  { %s1247_s14 = smov 0   ;;  %s1249_s15 = smov 0  }
   0x2   :  { %s1251_s16 = smov 0   ;;  %s1253_s17 = smov 0  }
   0x3   :  { %s1255_s18 = smov 0  }
   0x4 LB: > { %s23_s19 = sadd.s32 1, %s1212_s16  ;;  %s26_s20 = sadd.s32 1, %s1216_s17  ;;  %s1220_s18 = sphi %s1255_s18, %s14_s18   ;;  %s1216_s17 = sphi %s1253_s17, %s1571_s17   ;;  %s1212_s16 = sphi %s1251_s16, %s1570_s16   ;;  %s1208_s15 = sphi %s1249_s15, %s1569_s15   ;;  %s1204_s14 = sphi %s1247_s14, %s1568_s14   ;;  %s1200_s13 = sphi %s1245_s13, %s1567_s13   ;;  %s1196_s12 = sphi %s1243_s12, %s1566_s12  }
   0x5   : > { %p24_p0 = scmp.ge.s32.totalorder %s23_s19, 2  ;;  %p42_p1 = scmp.ne.s32.totalorder %s1200_s13, %s1196_s12 }
   0x6   : > { %p43_p2 = scmp.eq.s32.totalorder %s1220_s18, 0  ;;  %s1288_s21 = sadd.s32 %s1212_s16, %s1216_s17 }
   0x7   : > { %s1573_s19 = smov (%p24_p0, %s23_s19), 0  ;;  %s1575_s20 = smov (!%p24_p0, %s26_s20), %s1216_s17 }
   0x8   : > { %p28_p3 = scmp.ge.s32.totalorder %s1575_s20, 2  ;;  %p1290_p4 = por %p43_p2, %p42_p1 }
   0x9   : > { %s35_s25 = sadd.s32 1, %s1200_s13  ;;  %p1094_p6 = scmp.ge.s32.totalorder %s1220_s18, 4 }
   0xa   : > { %s1577_s20 = smov (%p28_p3, %s1575_s20), 0 }
   0xb   : > { %s31_s23 = sadd.s32 %s1577_s20, %s1573_s19  ;;  %148 = sbr.rel (%p1094_p6) target bundleno = 36 (0x24), region = 16 }
   0xc   : > { %s32_s24 = ssub.s32 %s1288_s21, %s31_s23 }
   0xd   : > { %p33_p5 = scmp.eq.s32.totalorder %s32_s24, 0 }
   0xf   : > { %s1301_s26 = scalar_select %p33_p5, %s1200_s13, %s35_s25  }
  0x12   : > { %151 = sbr.rel (!%p1290_p4) target bundleno = 27 (0x1b), region = 20  ;;  %s153_s27 = sand.u32 (%p1290_p4), 1, %s1200_s13  }
  0x13   : > { %s1096_s28 = sshll.u32 (%p1290_p4), %s1288_s21, 2  ;;  %s1095_s29 = sshll.u32 (%p1290_p4), %s153_s27, 5 }
  0x14   : > { %s158_s5 = scalar_lea.vmem (%p1290_p4), %s1559_s0, %s1096_s28  ;;  %s155_s6 = scalar_lea.vmem (%p1290_p4), [#allocation2], %s1095_s29 }
  0x15   : > { %v174_v0 = vld [vmem:[%s158_s5] sm:$0xf] (%p1290_p4)  ;;  %v176_v1 = vld [vmem:[%s158_s5 + $0xc] sm:$0xf] (%p1290_p4)  ;;  %v178_v2 = vld [vmem:[%s158_s5 + $0x18] sm:$0xf] (%p1290_p4) }
  0x16   : > { %175 = vst [vmem:[%s155_s6] sm:$0xf] (%p1290_p4), %v174_v0  ;;  %177 = vst [vmem:[%s155_s6 + $0x4] sm:$0xf] (%p1290_p4), %v176_v1  ;;  %v180_v3 = vld [vmem:[%s158_s5 + $0x24] sm:$0xf] (%p1290_p4) }
  0x17   : > { %v182_v4 = vld [vmem:[%s158_s5 + $0x30] sm:$0xf] (%p1290_p4)  ;;  %179 = vst [vmem:[%s155_s6 + $0x8] sm:$0xf] (%p1290_p4), %v178_v2  ;;  %181 = vst [vmem:[%s155_s6 + $0xc] sm:$0xf] (%p1290_p4), %v180_v3 }
  0x18   : > { %183 = vst [vmem:[%s155_s6 + $0x10] sm:$0xf] (%p1290_p4), %v182_v4  ;;  %v184_v5 = vld [vmem:[%s158_s5 + $0x3c] sm:$0xf] (%p1290_p4)  ;;  %v186_v6 = vld [vmem:[%s158_s5 + $0x48] sm:$0xf] (%p1290_p4) }
  0x19   : > { %v188_v7 = vld [vmem:[%s158_s5 + $0x54] sm:$0xf]  ;;  %185 = vst [vmem:[%s155_s6 + $0x14] sm:$0xf] %v184_v5  ;;  %187 = vst [vmem:[%s155_s6 + $0x18] sm:$0xf] %v186_v6 }
  0x1a   : > { %189 = vst [vmem:[%s155_s6 + $0x1c] sm:$0xf] %v188_v7 }
  0x1b PF: > { %228 = sbr.rel (!%p1290_p4) target bundleno = 36 (0x24), region = 61  ;;  %s230_s7 = sand.u32 (%p1290_p4), 1, %s1200_s13  }
  0x1c   : > { %s1098_s8 = sshll.u32 (%p1290_p4), %s1288_s21, 2  ;;  %s1097_s9 = sshll.u32 (%p1290_p4), %s230_s7, 5 }
  0x1d   : > { %s235_s23 = scalar_lea.vmem (%p1290_p4), %s1560_s1, %s1098_s8  ;;  %s232_s24 = scalar_lea.vmem (%p1290_p4), [#allocation3], %s1097_s9 }
  0x1e   : > { %v251_v8 = vld [vmem:[%s235_s23] sm:$0xf] (%p1290_p4)  ;;  %v253_v9 = vld [vmem:[%s235_s23 + $0xc] sm:$0xf] (%p1290_p4)  ;;  %v255_v10 = vld [vmem:[%s235_s23 + $0x18] sm:$0xf] (%p1290_p4) }
  0x1f   : > { %252 = vst [vmem:[%s232_s24] sm:$0xf] (%p1290_p4), %v251_v8  ;;  %254 = vst [vmem:[%s232_s24 + $0x4] sm:$0xf] (%p1290_p4), %v253_v9  ;;  %v257_v11 = vld [vmem:[%s235_s23 + $0x24] sm:$0xf] (%p1290_p4) }
  0x20   : > { %v259_v12 = vld [vmem:[%s235_s23 + $0x30] sm:$0xf] (%p1290_p4)  ;;  %256 = vst [vmem:[%s232_s24 + $0x8] sm:$0xf] (%p1290_p4), %v255_v10  ;;  %258 = vst [vmem:[%s232_s24 + $0xc] sm:$0xf] (%p1290_p4), %v257_v11 }
  0x21   : > { %260 = vst [vmem:[%s232_s24 + $0x10] sm:$0xf] (%p1290_p4), %v259_v12  ;;  %v261_v13 = vld [vmem:[%s235_s23 + $0x3c] sm:$0xf] (%p1290_p4)  ;;  %v263_v14 = vld [vmem:[%s235_s23 + $0x48] sm:$0xf] (%p1290_p4) }
  0x22   : > { %v265_v15 = vld [vmem:[%s235_s23 + $0x54] sm:$0xf]  ;;  %262 = vst [vmem:[%s232_s24 + $0x14] sm:$0xf] %v261_v13  ;;  %264 = vst [vmem:[%s232_s24 + $0x18] sm:$0xf] %v263_v14 }
  0x23   : > { %266 = vst [vmem:[%s232_s24 + $0x1c] sm:$0xf] %v265_v15 }
  0x24 PF: > { %p1099_p7 = scmp.ge.s32.totalorder %s1220_s18, 1  ;;  %p304_p8 = scmp.lt.s32.totalorder %s1220_s18, 5 }
  0x26   : > { %p305_p9 = pnand %p1099_p7, %p304_p8 }
  0x27   : > { %s311_s21 = sand.u32 (!%p305_p9), 1, %s1196_s12   ;;  %p350_p10 = scmp.lt.s32.totalorder (!%p305_p9), %s1208_s15, 1 }
  0x28   : > { %308 = sbr.rel (%p305_p9) target bundleno = 203 (0xcb), region = 102  ;;  %s1100_s22 = sshll.u32 (!%p305_p9), %s311_s21, 5 }
  0x29   : > { %s1333_s7 = scalar_lea.vmem (!%p305_p9), [#allocation2], %s1100_s22  ;;  %s1335_s8 = scalar_lea.vmem (!%p305_p9), [#allocation3], %s1100_s22 }
  0x2a   : > { %p1104_p11 = scmp.ne.s32.totalorder (!%p305_p9), %s1204_s14, 0 }
  0x2f   : > { %s351_s25 = scalar_select %p350_p10, %s1208_s15, 1 }
  0x30   : > { %362 = sbr.rel (%p1104_p11) target bundleno = 55 (0x37), region = 114  ;;  %v1222_v16 = vmov (!%p1104_p11), -inf  }
  0x31   : > { %s1102_s27 = sshll.u32 %s351_s25, 3 }
  0x32   : > { %s1326_s30 = scalar_lea.vmem %s1561_s2, %s1102_s27  ;;  %s1331_s6 = scalar_lea.vmem %s1562_s3, %s1102_s27 }
  0x33   : > { %363 = vst [vmem:[%s1326_s30] sm:$0xff] (!%p1104_p11), %v1222_v16  ;;  %364 = vst [vmem:[%s1331_s6] sm:$0xff] (!%p1104_p11), %v1222_v16 }
  0x37 PF: > { %s1342_s12 = sadd.s32 %s1204_s14, %s1208_s15 }
  0x38   : > { %p1105_p12 = scmp.ge.s32.totalorder %s1342_s12, 2 }
  0x39   : > { %v371_v17 = vld [vmem:[%s1333_s7] sm:$0xf] (!%p1105_p12)  ;;  %v372_v18 = vld [vmem:[%s1333_s7 + $0x4] sm:$0xf] (!%p1105_p12)  ;;  %v373_v19 = vld [vmem:[%s1333_s7 + $0x8] sm:$0xf] (!%p1105_p12) }
  0x3a   : > { %370 = sbr.rel (%p1105_p12) target bundleno = 125 (0x7d), region = 118  ;;  %v374_v20 = vld [vmem:[%s1333_s7 + $0xc] sm:$0xf] (!%p1105_p12)  ;;  %v375_v21 = vld [vmem:[%s1333_s7 + $0x10] sm:$0xf] (!%p1105_p12)  ;;  %vm388_vm0 = vcmask (!%p1105_p12), 1043456  }
  0x3b   : > { %v391_v22 = vsel (!%p1105_p12), %vm388_vm0, %v371_v17, 4286644096  ;;  %v404_v23 = vsel (!%p1105_p12), %vm388_vm0, %v372_v18, 4286644096  ;;  %v417_v24 = vsel (!%p1105_p12), %vm388_vm0, %v373_v19, 4286644096 }
  0x3c   : > { %v376_v25 = vld [vmem:[%s1333_s7 + $0x14] sm:$0xf] (!%p1105_p12)  ;;  %v393_v26 = vunpack.i.l.bf16 (!%p1105_p12), %v391_v22  ;;  %v394_v27 = vunpack.i.h.bf16 (!%p1105_p12), %v391_v22  ;;  %v406_v28 = vunpack.i.l.bf16 (!%p1105_p12), %v404_v23  ;;  %v407_v29 = vunpack.i.h.bf16 (!%p1105_p12), %v404_v23  ;;  %v377_v34 = vld [vmem:[%s1333_s7 + $0x18] sm:$0xf] (!%p1105_p12)  ;;  %v378_v47 = vld [vmem:[%s1333_s7 + $0x1c] sm:$0xf] (!%p1105_p12) }
  0x3d   : > { %v419_v30 = vunpack.i.l.bf16 (!%p1105_p12), %v417_v24  ;;  %v420_v31 = vunpack.i.h.bf16 (!%p1105_p12), %v417_v24  ;;  %v430_v32 = vsel (!%p1105_p12), %vm388_vm0, %v374_v20, 4286644096  ;;  %v443_v33 = vsel (!%p1105_p12), %vm388_vm0, %v375_v21, 4286644096 }
  0x3e   : > { %v395_v35 = vmax.f32 (!%p1105_p12), %v393_v26, %v394_v27  ;;  %v408_v36 = vmax.f32 (!%p1105_p12), %v406_v28, %v407_v29  ;;  %v432_v37 = vunpack.i.l.bf16 (!%p1105_p12), %v430_v32  ;;  %v433_v38 = vunpack.i.h.bf16 (!%p1105_p12), %v430_v32 }
  0x3f   : > { %v421_v39 = vmax.f32 (!%p1105_p12), %v419_v30, %v420_v31  ;;  %v445_v40 = vunpack.i.l.bf16 (!%p1105_p12), %v443_v33  ;;  %v446_v41 = vunpack.i.h.bf16 (!%p1105_p12), %v443_v33  ;;  %v456_v42 = vsel (!%p1105_p12), %vm388_vm0, %v376_v25, 4286644096 }
  0x40   : > { %v396_v43 = vrot.slane (!%p1105_p12), %v395_v35, 4  ;;  %v409_v44 = vrot.slane (!%p1105_p12), %v408_v36, 4  ;;  %v434_v45 = vmax.f32 (!%p1105_p12), %v432_v37, %v433_v38  ;;  %v458_v46 = vunpack.i.l.bf16 (!%p1105_p12), %v456_v42 }
  0x41   : > { %v422_v48 = vrot.slane %v421_v39, 4  ;;  %v447_v49 = vmax.f32 %v445_v40, %v446_v41  ;;  %v459_v50 = vunpack.i.h.bf16 %v456_v42  ;;  %v469_v51 = vsel %vm388_vm0, %v377_v34, 4286644096 }
  0x42   : > { %v397_v52 = vmax.f32 %v395_v35, %v396_v43  ;;  %v410_v53 = vmax.f32 %v408_v36, %v409_v44  ;;  %v435_v54 = vrot.slane %v434_v45, 4  ;;  %v471_v55 = vunpack.i.l.bf16 %v469_v51 }
  0x43   : > { %v423_v56 = vmax.f32 %v421_v39, %v422_v48  ;;  %v448_v57 = vrot.slane %v447_v49, 4  ;;  %v460_v58 = vmax.f32 %v458_v46, %v459_v50  ;;  %v472_v59 = vunpack.i.h.bf16 %v469_v51  ;;  %v380_v48 = vld [vmem:[%s1335_s8 + $0x4] sm:$0xf] }
  0x44   : > { %v398_v60 = vrot.slane %v397_v52, 2  ;;  %v411_v61 = vrot.slane %v410_v53, 2  ;;  %v436_v62 = vmax.f32 %v434_v45, %v435_v54  ;;  %v482_v63 = vsel %vm388_vm0, %v378_v47, 4286644096  ;;  %v379_v47 = vld [vmem:[%s1335_s8] sm:$0xf] }
  0x45   : > { %v424_v0 = vrot.slane %v423_v56, 2  ;;  %v449_v1 = vmax.f32 %v447_v49, %v448_v57  ;;  %v461_v2 = vrot.slane %v460_v58, 4  ;;  %v473_v3 = vmax.f32 %v471_v55, %v472_v59  ;;  %v381_v55 = vld [vmem:[%s1335_s8 + $0x8] sm:$0xf] }
  0x46   : > { %vm510_vm1 = vcmask 1041409   ;;  %v399_v4 = vmax.f32 %v397_v52, %v398_v60  ;;  %v412_v5 = vmax.f32 %v410_v53, %v411_v61  ;;  %v437_v6 = vrot.slane %v436_v62, 2 }
  0x47   : > { %v484_v7 = vunpack.i.l.bf16 %v482_v63  ;;  %vm512_vm2 = vcmask 1042434   ;;  %v425_v8 = vmax.f32 %v423_v56, %v424_v0  ;;  %v450_v9 = vrot.slane %v449_v1, 2 }
  0x48   : > { %v462_v10 = vmax.f32 %v460_v58, %v461_v2  ;;  %v474_v11 = vrot.slane %v473_v3, 4  ;;  %v400_v12 = vrot.slane %v399_v4, 1  ;;  %v413_v13 = vrot.slane %v412_v5, 1 }
  0x49   : > { %v438_v14 = vmax.f32 %v436_v62, %v437_v6  ;;  %v485_v15 = vunpack.i.h.bf16 %v482_v63  ;;  %v426_v16 = vrot.slane %v425_v8, 1  ;;  %v451_v17 = vmax.f32 %v449_v1, %v450_v9  ;;  %v382_v62 = vld [vmem:[%s1335_s8 + $0xc] sm:$0xf]  ;;  %v383_v63 = vld [vmem:[%s1335_s8 + $0x10] sm:$0xf] }
  0x4a   : > { %v463_v18 = vrot.slane %v462_v10, 2  ;;  %v475_v19 = vmax.f32 %v473_v3, %v474_v11  ;;  %v401_v20 = vmax.f32 %v399_v4, %v400_v12  ;;  %v414_v21 = vmax.f32 %v412_v5, %v413_v13  ;;  %v384_v12 = vld [vmem:[%s1335_s8 + $0x14] sm:$0xf] }
  0x4b   : > { %v439_v22 = vrot.slane %v438_v14, 1  ;;  %v486_v23 = vmax.f32 %v484_v7, %v485_v15  ;;  %v427_v24 = vmax.f32 %v425_v8, %v426_v16  ;;  %v452_v25 = vrot.slane %v451_v17, 1 }
  0x4c   : > { %v464_v26 = vmax.f32 %v462_v10, %v463_v18  ;;  %v476_v27 = vrot.slane %v475_v19, 2  ;;  %v402_v28 = vpack.i.bf16 %v401_v20, %v401_v20  ;;  %v415_v29 = vpack.i.bf16 %v414_v21, %v414_v21  ;;  %v387_v21 = vld [vmem:[%s1326_s30] sm:$0xff] }
  0x4d   : > { %v440_v30 = vmax.f32 %v438_v14, %v439_v22  ;;  %v487_v31 = vrot.slane %v486_v23, 4  ;;  %v428_v32 = vpack.i.bf16 %v427_v24, %v427_v24  ;;  %v453_v33 = vmax.f32 %v451_v17, %v452_v25 }
  0x4e   : > { %v465_v34 = vrot.slane %v464_v26, 1  ;;  %v477_v35 = vmax.f32 %v475_v19, %v476_v27  ;;  %v494_v38 = vunpack.c.l.bf16 %v402_v28  ;;  %v495_v39 = vunpack.c.l.bf16 %v415_v29 }
  0x4f   : > { %v441_v36 = vpack.i.bf16 %v440_v30, %v440_v30  ;;  %v488_v37 = vmax.f32 %v486_v23, %v487_v31  ;;  %v454_v40 = vpack.i.bf16 %v453_v33, %v453_v33  ;;  %v496_v43 = vunpack.c.l.bf16 %v428_v32 }
  0x50   : > { %v466_v41 = vmax.f32 %v464_v26, %v465_v34  ;;  %v478_v42 = vrot.slane %v477_v35, 1  ;;  %v511_v46 = vsel %vm510_vm1, %v495_v39, %v494_v38  ;;  %vm514_vm3 = vcmask 1043459   ;;  %v385_v26 = vld [vmem:[%s1335_s8 + $0x18] sm:$0xf]  ;;  %v386_v39 = vld [vmem:[%s1335_s8 + $0x1c] sm:$0xf] }
  0x51   : > { %v489_v44 = vrot.slane %v488_v37, 2  ;;  %v497_v45 = vunpack.c.l.bf16 %v441_v36  ;;  %v498_v51 = vunpack.c.l.bf16 %v454_v40  ;;  %v513_v52 = vsel %vm512_vm2, %v496_v43, %v511_v46 }
  0x52   : > { %v467_v49 = vpack.i.bf16 %v466_v41, %v466_v41  ;;  %v479_v50 = vmax.f32 %v477_v35, %v478_v42  ;;  %vm516_vm4 = vcmask 1044484   ;;  %vm518_vm5 = vcmask 1045509  }
  0x53   : > { %v490_v53 = vmax.f32 %v488_v37, %v489_v44  ;;  %v515_v54 = vsel %vm514_vm3, %v497_v45, %v513_v52  ;;  %vm520_vm6 = vcmask 1046534   ;;  %vm522_vm7 = vcmask 1047559  }
  0x54   : > { %v480_v56 = vpack.i.bf16 %v479_v50, %v479_v50  ;;  %v499_v57 = vunpack.c.l.bf16 %v467_v49  ;;  %v517_v58 = vsel %vm516_vm4, %v498_v51, %v515_v54  ;;  %v529_v60 = vsel %vm388_vm0, %v379_v47, 4286644096 }
  0x55   : > { %v491_v59 = vrot.slane %v490_v53, 1  ;;  %v542_v61 = vsel %vm388_vm0, %v380_v48, 4286644096  ;;  %v531_v2 = vunpack.i.l.bf16 %v529_v60  ;;  %v532_v3 = vunpack.i.h.bf16 %v529_v60 }
  0x56   : > { %v500_v0 = vunpack.c.l.bf16 %v480_v56  ;;  %v519_v1 = vsel %vm518_vm5, %v499_v57, %v517_v58  ;;  %v544_v5 = vunpack.i.l.bf16 %v542_v61  ;;  %v545_v6 = vunpack.i.h.bf16 %v542_v61 }
  0x57   : > { %v492_v4 = vmax.f32 %v490_v53, %v491_v59  ;;  %v555_v7 = vsel %vm388_vm0, %v381_v55, 4286644096  ;;  %v533_v9 = vmax.f32 %v531_v2, %v532_v3  ;;  %v568_v15 = vsel %vm388_vm0, %v382_v62, 4286644096 }
  0x58   : > { %v521_v8 = vsel %vm520_vm6, %v500_v0, %v519_v1  ;;  %v557_v10 = vunpack.i.l.bf16 %v555_v7  ;;  %v558_v11 = vunpack.i.h.bf16 %v555_v7  ;;  %v546_v14 = vmax.f32 %v544_v5, %v545_v6 }
  0x59   : > { %v493_v13 = vpack.i.bf16 %v492_v4, %v492_v4  ;;  %v581_v16 = vsel %vm388_vm0, %v383_v63, 4286644096  ;;  %v534_v17 = vrot.slane %v533_v9, 4  ;;  %v570_v19 = vunpack.i.l.bf16 %v568_v15 }
  0x5a   : > { %v559_v18 = vmax.f32 %v557_v10, %v558_v11  ;;  %v571_v20 = vunpack.i.h.bf16 %v568_v15  ;;  %v547_v23 = vrot.slane %v546_v14, 4  ;;  %v583_v24 = vunpack.i.l.bf16 %v581_v16 }
  0x5b   : > { %v501_v22 = vunpack.c.l.bf16 %v493_v13  ;;  %v584_v25 = vunpack.i.h.bf16 %v581_v16  ;;  %v535_v27 = vmax.f32 %v533_v9, %v534_v17  ;;  %v594_v30 = vsel %vm388_vm0, %v384_v12, 4286644096 }
  0x5c   : > { %v560_v28 = vrot.slane %v559_v18, 4  ;;  %v572_v29 = vmax.f32 %v570_v19, %v571_v20  ;;  %v548_v32 = vmax.f32 %v546_v14, %v547_v23  ;;  %v596_v34 = vunpack.i.l.bf16 %v594_v30 }
  0x5d   : > { %v523_v31 = vsel %vm522_vm7, %v501_v22, %v521_v8  ;;  %v585_v33 = vmax.f32 %v583_v24, %v584_v25  ;;  %v536_v36 = vrot.slane %v535_v27, 2  ;;  %v597_v42 = vunpack.i.h.bf16 %v594_v30 }
  0x5e   : > { %v525_v35 = vmax.f32 %v387_v21, %v523_v31  ;;  %v561_v37 = vmax.f32 %v559_v18, %v560_v28  ;;  %v573_v38 = vrot.slane %v572_v29, 4  ;;  %v549_v40 = vrot.slane %v548_v32, 2 }
  0x5f   : > { %v586_v41 = vrot.slane %v585_v33, 4  ;;  %v607_v43 = vsel %vm388_vm0, %v385_v26, 4286644096  ;;  %v537_v44 = vmax.f32 %v535_v27, %v536_v36  ;;  %v598_v50 = vmax.f32 %v596_v34, %v597_v42 }
  0x60   : > { %526 = vst [vmem:[%s1326_s30] sm:$0xff] %v525_v35  ;;  %v562_v45 = vrot.slane %v561_v37, 2  ;;  %v574_v46 = vmax.f32 %v572_v29, %v573_v38  ;;  %v609_v47 = vunpack.i.l.bf16 %v607_v43  ;;  %v550_v48 = vmax.f32 %v548_v32, %v549_v40 }
  0x61   : > { %v587_v49 = vmax.f32 %v585_v33, %v586_v41  ;;  %v610_v51 = vunpack.i.h.bf16 %v607_v43  ;;  %v538_v52 = vrot.slane %v537_v44, 1  ;;  %v620_v55 = vsel %vm388_vm0, %v386_v39, 4286644096 }
  0x62   : > { %v563_v53 = vmax.f32 %v561_v37, %v562_v45  ;;  %v575_v54 = vrot.slane %v574_v46, 2  ;;  %v551_v56 = vrot.slane %v550_v48, 1  ;;  %v599_v58 = vrot.slane %v598_v50, 4 }
  0x63   : > { %v588_v57 = vrot.slane %v587_v49, 2  ;;  %v611_v59 = vmax.f32 %v609_v47, %v610_v51  ;;  %v539_v60 = vmax.f32 %v537_v44, %v538_v52  ;;  %v622_v63 = vunpack.i.l.bf16 %v620_v55  ;;  %v527_v47 = vld [vmem:[%s1331_s6] sm:$0xff] }
  0x64   : > { %v564_v61 = vrot.slane %v563_v53, 1  ;;  %v576_v62 = vmax.f32 %v574_v46, %v575_v54  ;;  %v552_v0 = vmax.f32 %v550_v48, %v551_v56  ;;  %v600_v2 = vmax.f32 %v598_v50, %v599_v58 }
  0x65   : > { %v589_v1 = vmax.f32 %v587_v49, %v588_v57  ;;  %v612_v3 = vrot.slane %v611_v59, 4  ;;  %v540_v4 = vpack.i.bf16 %v539_v60, %v539_v60  ;;  %v623_v7 = vunpack.i.h.bf16 %v620_v55 }
  0x66   : > { %v565_v5 = vmax.f32 %v563_v53, %v564_v61  ;;  %v577_v6 = vrot.slane %v576_v62, 1  ;;  %v553_v8 = vpack.i.bf16 %v552_v0, %v552_v0  ;;  %v601_v10 = vrot.slane %v600_v2, 2 }
  0x67   : > { %v590_v9 = vrot.slane %v589_v1, 1  ;;  %v613_v11 = vmax.f32 %v611_v59, %v612_v3  ;;  %v624_v14 = vmax.f32 %v622_v63, %v623_v7  ;;  %v632_v15 = vunpack.c.l.bf16 %v540_v4 }
  0x68   : > { %v566_v12 = vpack.i.bf16 %v565_v5, %v565_v5  ;;  %v578_v13 = vmax.f32 %v576_v62, %v577_v6  ;;  %v602_v17 = vmax.f32 %v600_v2, %v601_v10  ;;  %v633_v19 = vunpack.c.l.bf16 %v553_v8 }
  0x69   : > { %v591_v16 = vmax.f32 %v589_v1, %v590_v9  ;;  %v614_v18 = vrot.slane %v613_v11, 2  ;;  %v625_v21 = vrot.slane %v624_v14, 4 }
  0x6a   : > { %v579_v20 = vpack.i.bf16 %v578_v13, %v578_v13  ;;  %v634_v22 = vunpack.c.l.bf16 %v566_v12  ;;  %v603_v24 = vrot.slane %v602_v17, 1  ;;  %v648_v26 = vsel %vm510_vm1, %v633_v19, %v632_v15 }
  0x6b   : > { %v592_v23 = vpack.i.bf16 %v591_v16, %v591_v16  ;;  %v615_v25 = vmax.f32 %v613_v11, %v614_v18  ;;  %v626_v27 = vmax.f32 %v624_v14, %v625_v21 }
  0x6c   : > { %v635_v28 = vunpack.c.l.bf16 %v579_v20  ;;  %v649_v29 = vsel %vm512_vm2, %v634_v22, %v648_v26  ;;  %v604_v30 = vmax.f32 %v602_v17, %v603_v24 }
  0x6d   : > { %v616_v31 = vrot.slane %v615_v25, 1  ;;  %v636_v32 = vunpack.c.l.bf16 %v592_v23  ;;  %v627_v33 = vrot.slane %v626_v27, 2 }
  0x6e   : > { %v650_v34 = vsel %vm514_vm3, %v635_v28, %v649_v29  ;;  %v605_v35 = vpack.i.bf16 %v604_v30, %v604_v30 }
  0x6f   : > { %v617_v36 = vmax.f32 %v615_v25, %v616_v31  ;;  %v628_v37 = vmax.f32 %v626_v27, %v627_v33  ;;  %v651_v40 = vsel %vm516_vm4, %v636_v32, %v650_v34 }
  0x70   : > { %v637_v39 = vunpack.c.l.bf16 %v605_v35 }
  0x71   : > { %v618_v38 = vpack.i.bf16 %v617_v36, %v617_v36  ;;  %v629_v41 = vrot.slane %v628_v37, 1 }
  0x72   : > { %v652_v44 = vsel %vm518_vm5, %v637_v39, %v651_v40 }
  0x73   : > { %v638_v42 = vunpack.c.l.bf16 %v618_v38  ;;  %v630_v43 = vmax.f32 %v628_v37, %v629_v41 }
  0x75   : > { %v631_v45 = vpack.i.bf16 %v630_v43, %v630_v43  ;;  %v653_v46 = vsel %vm520_vm6, %v638_v42, %v652_v44 }
  0x77   : > { %v639_v48 = vunpack.c.l.bf16 %v631_v45 }
  0x79   : > { %v654_v49 = vsel %vm522_vm7, %v639_v48, %v653_v46 }
  0x7a   : > { %v656_v50 = vmax.f32 %v527_v47, %v654_v49 }
  0x7c   : > { %657 = vst [vmem:[%s1331_s6] sm:$0xff] %v656_v50 }
  0x7d PF: > { %p1106_p13 = scmp.ne.s32.totalorder %s1342_s12, 2 }
  0x7e   : > { %v661_v51 = vlaneseq (!%p1106_p13)  ;;  %v664_v52 = vld [vmem:[%s1333_s7] sm:$0xf] (!%p1106_p13)  ;;  %v665_v53 = vld [vmem:[%s1333_s7 + $0x4] sm:$0xf] (!%p1106_p13)  ;;  %v666_v54 = vld [vmem:[%s1333_s7 + $0x8] sm:$0xf] (!%p1106_p13) }
  0x7f   : > { %660 = sbr.rel (%p1106_p13) target bundleno = 203 (0xcb), region = 122  ;;  %v667_v56 = vld [vmem:[%s1333_s7 + $0xc] sm:$0xf] (!%p1106_p13)  ;;  %v668_v57 = vld [vmem:[%s1333_s7 + $0x10] sm:$0xf] (!%p1106_p13)  ;;  %vm700_vm10 = vcmask (!%p1106_p13), 1043456  }
  0x80   : > { %v662_v55 = vshrl.u32 (!%p1106_p13), %v661_v51, 7  ;;  %v669_v58 = vld [vmem:[%s1333_s7 + $0x14] sm:$0xf] (!%p1106_p13)  ;;  %v670_v59 = vld [vmem:[%s1333_s7 + $0x18] sm:$0xf] (!%p1106_p13)  ;;  %vm822_vm11 = vcmask (!%p1106_p13), 1041409  }
  0x81   : > { %v671_v60 = vld [vmem:[%s1333_s7 + $0x1c] sm:$0xf] (!%p1106_p13)  ;;  %v1405_v61 = vld [vmem:[%s1335_s8] sm:$0xf] (!%p1106_p13)  ;;  %v1408_v62 = vld [vmem:[%s1335_s8 + $0x4] sm:$0xf] (!%p1106_p13) }
  0x82   : > { %vm663_vm8 = vcmp.lt.s32.totalorder (!%p1106_p13), %v662_v55, 4  ;;  %v1411_v63 = vld [vmem:[%s1335_s8 + $0x8] sm:$0xf] (!%p1106_p13)  ;;  %v1418_v1 = vld [vmem:[%s1335_s8 + $0xc] sm:$0xf] (!%p1106_p13)  ;;  %vm824_vm12 = vcmask (!%p1106_p13), 1042434  }
  0x83   : > { %vm1413_vm9 = vmpackc.low (!%p1106_p13), %vm663_vm8, %vm663_vm8  ;;  %v1421_v2 = vld [vmem:[%s1335_s8 + $0x10] sm:$0xf] (!%p1106_p13)  ;;  %v1424_v3 = vld [vmem:[%s1335_s8 + $0x14] sm:$0xf] (!%p1106_p13)  ;;  %vm826_vm13 = vcmask (!%p1106_p13), 1043459   ;;  %vm828_vm14 = vcmask (!%p1106_p13), 1044484  }
  0x84   : > { %v675_v4 = vsel (!%p1106_p13), %vm1413_vm9, %v664_v52, 4286644096  ;;  %v676_v5 = vsel (!%p1106_p13), %vm1413_vm9, %v665_v53, 4286644096  ;;  %v677_v6 = vsel (!%p1106_p13), %vm1413_vm9, %v666_v54, 4286644096 }
  0x85   : > { %v1433_v7 = vld [vmem:[%s1335_s8 + $0x18] sm:$0xf] (!%p1106_p13)  ;;  %v678_v8 = vsel (!%p1106_p13), %vm1413_vm9, %v667_v56, 4286644096  ;;  %v679_v9 = vsel (!%p1106_p13), %vm1413_vm9, %v668_v57, 4286644096 }
  0x86   : > { %v680_v10 = vsel %vm1413_vm9, %v669_v58, 4286644096  ;;  %v681_v11 = vsel %vm1413_vm9, %v670_v59, 4286644096  ;;  %v682_v12 = vsel %vm1413_vm9, %v671_v60, 4286644096 }
  0x87   : > { %v1446_v13 = vld [vmem:[%s1335_s8 + $0x1c] sm:$0xf]  ;;  %v691_v14 = vsel %vm1413_vm9, %v1405_v61, 4286644096  ;;  %v692_v15 = vsel %vm1413_vm9, %v1408_v62, 4286644096 }
  0x88   : > { %v693_v16 = vsel %vm1413_vm9, %v1411_v63, 4286644096  ;;  %v694_v17 = vsel %vm1413_vm9, %v1418_v1, 4286644096  ;;  %v695_v18 = vsel %vm1413_vm9, %v1421_v2, 4286644096 }
  0x89   : > { %v696_v19 = vsel %vm1413_vm9, %v1424_v3, 4286644096  ;;  %v697_v20 = vsel %vm1413_vm9, %v1433_v7, 4286644096  ;;  %v698_v21 = vsel %vm1413_vm9, %v1446_v13, 4286644096 }
  0x8a   : > { %v703_v22 = vsel %vm700_vm10, %v675_v4, 4286644096  ;;  %v716_v25 = vsel %vm700_vm10, %v676_v5, 4286644096  ;;  %v729_v26 = vsel %vm700_vm10, %v677_v6, 4286644096 }
  0x8b   : > { %v705_v23 = vunpack.i.l.bf16 %v703_v22  ;;  %v706_v24 = vunpack.i.h.bf16 %v703_v22  ;;  %v718_v27 = vunpack.i.l.bf16 %v716_v25  ;;  %v719_v28 = vunpack.i.h.bf16 %v716_v25 }
  0x8c   : > { %v731_v29 = vunpack.i.l.bf16 %v729_v26  ;;  %v732_v30 = vunpack.i.h.bf16 %v729_v26  ;;  %v742_v32 = vsel %vm700_vm10, %v678_v8, 4286644096  ;;  %v755_v33 = vsel %vm700_vm10, %v679_v9, 4286644096 }
  0x8d   : > { %v707_v31 = vmax.f32 %v705_v23, %v706_v24  ;;  %v768_v34 = vsel %vm700_vm10, %v680_v10, 4286644096  ;;  %v720_v35 = vmax.f32 %v718_v27, %v719_v28  ;;  %v744_v37 = vunpack.i.l.bf16 %v742_v32 }
  0x8e   : > { %v733_v36 = vmax.f32 %v731_v29, %v732_v30  ;;  %v745_v38 = vunpack.i.h.bf16 %v742_v32  ;;  %v757_v40 = vunpack.i.l.bf16 %v755_v33  ;;  %v758_v41 = vunpack.i.h.bf16 %v755_v33 }
  0x8f   : > { %v708_v39 = vrot.slane %v707_v31, 4  ;;  %v770_v42 = vunpack.i.l.bf16 %v768_v34  ;;  %v721_v43 = vrot.slane %v720_v35, 4  ;;  %v771_v46 = vunpack.i.h.bf16 %v768_v34 }
  0x90   : > { %v734_v44 = vrot.slane %v733_v36, 4  ;;  %v746_v45 = vmax.f32 %v744_v37, %v745_v38  ;;  %v759_v48 = vmax.f32 %v757_v40, %v758_v41  ;;  %v781_v49 = vsel %vm700_vm10, %v681_v11, 4286644096 }
  0x91   : > { %v709_v47 = vmax.f32 %v707_v31, %v708_v39  ;;  %v794_v50 = vsel %vm700_vm10, %v682_v12, 4286644096  ;;  %v722_v51 = vmax.f32 %v720_v35, %v721_v43  ;;  %v772_v54 = vmax.f32 %v770_v42, %v771_v46 }
  0x92   : > { %v735_v52 = vmax.f32 %v733_v36, %v734_v44  ;;  %v747_v53 = vrot.slane %v746_v45, 4  ;;  %v760_v56 = vrot.slane %v759_v48, 4  ;;  %v783_v57 = vunpack.i.l.bf16 %v781_v49 }
  0x93   : > { %v710_v55 = vrot.slane %v709_v47, 2  ;;  %v784_v58 = vunpack.i.h.bf16 %v781_v49  ;;  %v723_v59 = vrot.slane %v722_v51, 2  ;;  %v773_v5 = vrot.slane %v772_v54, 4 }
  0x94   : > { %v736_v60 = vrot.slane %v735_v52, 2  ;;  %v748_v4 = vmax.f32 %v746_v45, %v747_v53  ;;  %v761_v8 = vmax.f32 %v759_v48, %v760_v56  ;;  %v796_v10 = vunpack.i.l.bf16 %v794_v50 }
  0x95   : > { %v711_v6 = vmax.f32 %v709_v47, %v710_v55  ;;  %v785_v9 = vmax.f32 %v783_v57, %v784_v58  ;;  %v724_v11 = vmax.f32 %v722_v51, %v723_v59  ;;  %v774_v23 = vmax.f32 %v772_v54, %v773_v5 }
  0x96   : > { %v737_v22 = vmax.f32 %v735_v52, %v736_v60  ;;  %v749_v12 = vrot.slane %v748_v4, 2  ;;  %v762_v25 = vrot.slane %v761_v8, 2  ;;  %v797_v27 = vunpack.i.h.bf16 %v794_v50 }
  0x97   : > { %v712_v24 = vrot.slane %v711_v6, 1  ;;  %v786_v26 = vrot.slane %v785_v9, 4  ;;  %v725_v28 = vrot.slane %v724_v11, 1  ;;  %v775_v31 = vrot.slane %v774_v23, 2 }
  0x98   : > { %v738_v29 = vrot.slane %v737_v22, 1  ;;  %v750_v30 = vmax.f32 %v748_v4, %v749_v12  ;;  %v763_v33 = vmax.f32 %v761_v8, %v762_v25  ;;  %v798_v35 = vmax.f32 %v796_v10, %v797_v27 }
  0x99   : > { %v713_v32 = vmax.f32 %v711_v6, %v712_v24  ;;  %v787_v34 = vmax.f32 %v785_v9, %v786_v26  ;;  %v726_v36 = vmax.f32 %v724_v11, %v725_v28  ;;  %v776_v39 = vmax.f32 %v774_v23, %v775_v31 }
  0x9a   : > { %v739_v37 = vmax.f32 %v737_v22, %v738_v29  ;;  %v751_v38 = vrot.slane %v750_v30, 1  ;;  %v764_v41 = vrot.slane %v763_v33, 1  ;;  %v799_v43 = vrot.slane %v798_v35, 4 }
  0x9b   : > { %v714_v40 = vpack.i.bf16 %v713_v32, %v713_v32  ;;  %v788_v42 = vrot.slane %v787_v34, 2  ;;  %v727_v44 = vpack.i.bf16 %v726_v36, %v726_v36  ;;  %v777_v47 = vrot.slane %v776_v39, 1 }
  0x9c   : > { %v740_v45 = vpack.i.bf16 %v739_v37, %v739_v37  ;;  %v752_v46 = vmax.f32 %v750_v30, %v751_v38  ;;  %v765_v48 = vmax.f32 %v763_v33, %v764_v41  ;;  %v800_v50 = vmax.f32 %v798_v35, %v799_v43  ;;  %v699_v38 = vld [vmem:[%s1326_s30] sm:$0xff] }
  0x9d   : > { %v789_v49 = vmax.f32 %v787_v34, %v788_v42  ;;  %v806_v51 = vunpack.c.l.bf16 %v714_v40  ;;  %v778_v53 = vmax.f32 %v776_v39, %v777_v47  ;;  %v807_v54 = vunpack.c.l.bf16 %v727_v44 }
  0x9e   : > { %v753_v52 = vpack.i.bf16 %v752_v46, %v752_v46  ;;  %v808_v55 = vunpack.c.l.bf16 %v740_v45  ;;  %v766_v56 = vpack.i.bf16 %v765_v48, %v765_v48  ;;  %v801_v58 = vrot.slane %v800_v50, 2 }
  0x9f   : > { %v790_v57 = vrot.slane %v789_v49, 1  ;;  %v779_v59 = vpack.i.bf16 %v778_v53, %v778_v53  ;;  %v823_v4 = vsel %vm822_vm11, %v807_v54, %v806_v51  ;;  %vm830_vm15 = vcmask 1045509  }
  0xa0   : > { %v809_v60 = vunpack.c.l.bf16 %v753_v52  ;;  %v802_v6 = vmax.f32 %v800_v50, %v801_v58  ;;  %v810_v8 = vunpack.c.l.bf16 %v766_v56  ;;  %v825_v9 = vsel %vm824_vm12, %v808_v55, %v823_v4 }
  0xa1   : > { %v791_v5 = vmax.f32 %v789_v49, %v790_v57  ;;  %v811_v10 = vunpack.c.l.bf16 %v779_v59  ;;  %vm832_vm0 = vcmask 1046534   ;;  %vm834_vm1 = vcmask 1047559  }
  0xa2   : > { %v827_v11 = vsel %vm826_vm13, %v809_v60, %v825_v9  ;;  %v803_v12 = vrot.slane %v802_v6, 1  ;;  %v841_v25 = vsel %vm700_vm10, %v691_v14, 4286644096  ;;  %v854_v26 = vsel %vm700_vm10, %v692_v15, 4286644096 }
  0xa3   : > { %v792_v22 = vpack.i.bf16 %v791_v5, %v791_v5  ;;  %v829_v23 = vsel %vm828_vm14, %v810_v8, %v827_v11  ;;  %v867_v27 = vsel %vm700_vm10, %v693_v16, 4286644096  ;;  %v843_v30 = vunpack.i.l.bf16 %v841_v25 }
  0xa4   : > { %v831_v24 = vsel %vm830_vm15, %v811_v10, %v829_v23  ;;  %v804_v28 = vmax.f32 %v802_v6, %v803_v12  ;;  %v844_v31 = vunpack.i.h.bf16 %v841_v25  ;;  %v856_v61 = vunpack.i.l.bf16 %v854_v26 }
  0xa5   : > { %v812_v29 = vunpack.c.l.bf16 %v792_v22  ;;  %v857_v32 = vunpack.i.h.bf16 %v854_v26  ;;  %v869_v14 = vunpack.i.l.bf16 %v867_v27  ;;  %v870_v33 = vunpack.i.h.bf16 %v867_v27 }
  0xa6   : > { %v805_v34 = vpack.i.bf16 %v804_v28, %v804_v28  ;;  %v845_v35 = vmax.f32 %v843_v30, %v844_v31  ;;  %v880_v63 = vsel %vm700_vm10, %v694_v17, 4286644096  ;;  %v893_v41 = vsel %vm700_vm10, %v695_v18, 4286644096 }
  0xa7   : > { %v833_v62 = vsel %vm832_vm0, %v812_v29, %v831_v24  ;;  %v858_v15 = vmax.f32 %v856_v61, %v857_v32  ;;  %v871_v16 = vmax.f32 %v869_v14, %v870_v33  ;;  %v882_v36 = vunpack.i.l.bf16 %v880_v63 }
  0xa8   : > { %v883_v37 = vunpack.i.h.bf16 %v880_v63  ;;  %v813_v39 = vunpack.c.l.bf16 %v805_v34  ;;  %v846_v40 = vrot.slane %v845_v35, 4  ;;  %v906_v1 = vsel %vm700_vm10, %v696_v19, 4286644096 }
  0xa9   : > { %v859_v17 = vrot.slane %v858_v15, 4  ;;  %v872_v42 = vrot.slane %v871_v16, 4  ;;  %v895_v44 = vunpack.i.l.bf16 %v893_v41  ;;  %v896_v47 = vunpack.i.h.bf16 %v893_v41 }
  0xaa   : > { %v884_v43 = vmax.f32 %v882_v36, %v883_v37  ;;  %v835_v45 = vsel %vm834_vm1, %v813_v39, %v833_v62  ;;  %v847_v46 = vmax.f32 %v845_v35, %v846_v40  ;;  %v908_v48 = vunpack.i.l.bf16 %v906_v1 }
  0xab   : > { %v837_v49 = vmax.f32 %v699_v38, %v835_v45  ;;  %v860_v2 = vmax.f32 %v858_v15, %v859_v17  ;;  %v873_v50 = vmax.f32 %v871_v16, %v872_v42  ;;  %v897_v52 = vmax.f32 %v895_v44, %v896_v47 }
  0xac   : > { %v885_v18 = vrot.slane %v884_v43, 4  ;;  %v848_v51 = vrot.slane %v847_v46, 2  ;;  %v909_v53 = vunpack.i.h.bf16 %v906_v1  ;;  %v919_v3 = vsel %vm700_vm10, %v697_v20, 4286644096 }
  0xad   : > { %838 = vst [vmem:[%s1326_s30] sm:$0xff] %v837_v49  ;;  %v861_v19 = vrot.slane %v860_v2, 2  ;;  %v874_v54 = vrot.slane %v873_v50, 2  ;;  %v921_v56 = vunpack.i.l.bf16 %v919_v3  ;;  %v898_v58 = vrot.slane %v897_v52, 4 }
  0xae   : > { %v886_v55 = vmax.f32 %v884_v43, %v885_v18  ;;  %v849_v57 = vmax.f32 %v847_v46, %v848_v51  ;;  %v910_v59 = vmax.f32 %v908_v48, %v909_v53  ;;  %v922_v60 = vunpack.i.h.bf16 %v919_v3 }
  0xaf   : > { %v862_v4 = vmax.f32 %v860_v2, %v861_v19  ;;  %v875_v5 = vmax.f32 %v873_v50, %v874_v54  ;;  %v932_v7 = vsel %vm700_vm10, %v698_v21, 4286644096  ;;  %v899_v20 = vmax.f32 %v897_v52, %v898_v58  ;;  %v839_v58 = vld [vmem:[%s1331_s6] sm:$0xff] }
  0xb0   : > { %v887_v6 = vrot.slane %v886_v55, 2  ;;  %v850_v8 = vrot.slane %v849_v57, 1  ;;  %v911_v9 = vrot.slane %v910_v59, 4  ;;  %v923_v10 = vmax.f32 %v921_v56, %v922_v60 }
  0xb1   : > { %v863_v11 = vrot.slane %v862_v4, 1  ;;  %v876_v22 = vrot.slane %v875_v5, 1  ;;  %v934_v23 = vunpack.i.l.bf16 %v932_v7  ;;  %v900_v25 = vrot.slane %v899_v20, 2 }
  0xb2   : > { %v888_v12 = vmax.f32 %v886_v55, %v887_v6  ;;  %v851_v24 = vmax.f32 %v849_v57, %v850_v8  ;;  %v912_v26 = vmax.f32 %v910_v59, %v911_v9  ;;  %v924_v27 = vrot.slane %v923_v10, 4 }
  0xb3   : > { %v864_v28 = vmax.f32 %v862_v4, %v863_v11  ;;  %v877_v29 = vmax.f32 %v875_v5, %v876_v22  ;;  %v935_v0 = vunpack.i.h.bf16 %v932_v7  ;;  %v901_v13 = vmax.f32 %v899_v20, %v900_v25 }
  0xb4   : > { %v889_v30 = vrot.slane %v888_v12, 1  ;;  %v852_v31 = vpack.i.bf16 %v851_v24, %v851_v24  ;;  %v913_v61 = vrot.slane %v912_v26, 2  ;;  %v925_v21 = vmax.f32 %v923_v10, %v924_v27 }
  0xb5   : > { %v865_v32 = vpack.i.bf16 %v864_v28, %v864_v28  ;;  %v878_v14 = vpack.i.bf16 %v877_v29, %v877_v29  ;;  %v936_v34 = vmax.f32 %v934_v23, %v935_v0  ;;  %v902_v62 = vrot.slane %v901_v13, 1 }
  0xb6   : > { %v890_v33 = vmax.f32 %v888_v12, %v889_v30  ;;  %v914_v35 = vmax.f32 %v912_v26, %v913_v61  ;;  %v926_v63 = vrot.slane %v925_v21, 2  ;;  %v944_v15 = vunpack.c.l.bf16 %v852_v31 }
  0xb7   : > { %v937_v36 = vrot.slane %v936_v34, 4  ;;  %v945_v37 = vunpack.c.l.bf16 %v865_v32  ;;  %v946_v38 = vunpack.c.l.bf16 %v878_v14  ;;  %v903_v39 = vmax.f32 %v901_v13, %v902_v62 }
  0xb8   : > { %v891_v16 = vpack.i.bf16 %v890_v33, %v890_v33  ;;  %v915_v40 = vrot.slane %v914_v35, 1  ;;  %v927_v41 = vmax.f32 %v925_v21, %v926_v63 }
  0xb9   : > { %v938_v1 = vmax.f32 %v936_v34, %v937_v36  ;;  %v960_v42 = vsel %vm822_vm11, %v945_v37, %v944_v15  ;;  %v904_v43 = vpack.i.bf16 %v903_v39, %v903_v39 }
  0xba   : > { %v947_v17 = vunpack.c.l.bf16 %v891_v16  ;;  %v916_v44 = vmax.f32 %v914_v35, %v915_v40  ;;  %v928_v45 = vrot.slane %v927_v41, 1  ;;  %v961_v46 = vsel %vm824_vm12, %v946_v38, %v960_v42 }
  0xbb   : > { %v939_v47 = vrot.slane %v938_v1, 2  ;;  %v948_v50 = vunpack.c.l.bf16 %v904_v43 }
  0xbc   : > { %v962_v48 = vsel %vm826_vm13, %v947_v17, %v961_v46  ;;  %v917_v49 = vpack.i.bf16 %v916_v44, %v916_v44  ;;  %v929_v2 = vmax.f32 %v927_v41, %v928_v45 }
  0xbd   : > { %v940_v18 = vmax.f32 %v938_v1, %v939_v47  ;;  %v963_v53 = vsel %vm828_vm14, %v948_v50, %v962_v48 }
  0xbe   : > { %v930_v51 = vpack.i.bf16 %v929_v2, %v929_v2  ;;  %v949_v52 = vunpack.c.l.bf16 %v917_v49 }
  0xbf   : > { %v941_v3 = vrot.slane %v940_v18, 1 }
  0xc0   : > { %v950_v19 = vunpack.c.l.bf16 %v930_v51  ;;  %v964_v55 = vsel %vm830_vm15, %v949_v52, %v963_v53 }
  0xc1   : > { %v942_v54 = vmax.f32 %v940_v18, %v941_v3 }
  0xc2   : > { %v965_v57 = vsel %vm832_vm0, %v950_v19, %v964_v55 }
  0xc3   : > { %v943_v56 = vpack.i.bf16 %v942_v54, %v942_v54 }
  0xc5   : > { %v951_v59 = vunpack.c.l.bf16 %v943_v56 }
  0xc7   : > { %v966_v60 = vsel %vm834_vm1, %v951_v59, %v965_v57 }
  0xc8   : > { %v968_v4 = vmax.f32 %v839_v58, %v966_v60 }
  0xca   : > { %969 = vst [vmem:[%s1331_s6] sm:$0xff] %v968_v4 }
  0xcb PF: > { %s14_s18 = sadd.s32 1, %s1220_s18   ;;  %s1566_s12 = smov %s1200_s13 }
  0xcc   : > { %p11_p0 = scmp.ge.s32.totalorder %s14_s18, 6   ;;  %s1567_s13 = smov %s1301_s26 }
  0xcd   : > { %s1568_s14 = smov %s1212_s16  ;;  %s1569_s15 = smov %s1216_s17 }
  0xce   : > { %s1570_s16 = smov %s1573_s19  ;;  %s1571_s17 = smov %s1577_s20 }
  0xcf   :  { %13 = sbr.rel (!%p11_p0) target bundleno = 4 (0x4), region = 177 }

</bundles_post_ra>
